<compile_context>
chip_gen: v7x
topology: tpu7x:2x2x1
jax: 0.10.0
libtpu: 0.0.40
codegen_flags: <defaults>
</compile_context>

<pallas_src>
import functools

import jax
import jax.numpy as jnp
from jax.experimental import pallas as pl
from jax.experimental.pallas import tpu as pltpu


def _dilconv_main_kernel(x_ref, weff_ref, y_ref, xpad_ref, *,
                         bt, cin, h, w, pad, kh, kw, stride, dilation, ho, wo):
    """ReLU -> im2col -> single MXU matmul (fused depthwise-dilated + 1x1 conv).

    x_ref    : (bt, Cin, H, W)          NCHW block (Cin on sublanes)
    weff_ref : (Cout, KH*KW*Cin)        fused effective weights
    y_ref    : (bt, Cout, Ho*Wo)        pre-BN output, lane-dense spatial
    xpad_ref : (Cin, Hp, Wp)            VMEM scratch for the zero-padded image
    """
    hw = ho * wo
    span_h = (ho - 1) * stride + 1
    span_w = (wo - 1) * stride + 1

    # Border zero-init once per grid step (interior is overwritten below;
    # ReLU(0) == 0 so the zero border is the correct padding value).
    if pad > 0:
        xpad_ref[...] = jnp.zeros_like(xpad_ref)

    for b in range(bt):                                   # static unroll, bt small
        # ReLU and write the interior of the padded scratch.
        xpad_ref[:, pad:pad + h, pad:pad + w] = jnp.maximum(x_ref[b], 0.0)

        # im2col: one ref-slice per tap (free view -> small load), stacked
        # along the contraction axis.
        cols = []
        for ih in range(kh):
            hs = ih * dilation
            for iw in range(kw):
                ws = iw * dilation
                patch = xpad_ref[:, hs:hs + span_h, ws:ws + span_w]
                if stride > 1:
                    patch = patch[:, ::stride, ::stride]
                cols.append(patch.reshape(cin, hw))       # (Cin, Ho*Wo)
        x_col = jnp.concatenate(cols, axis=0)             # (KH*KW*Cin, Ho*Wo)

        # Single MXU matmul: (Cout, K) x (K, HW) -> (Cout, HW), lane-dense.
        y = jax.lax.dot_general(
            weff_ref[...], x_col,
            dimension_numbers=(((1,), (0,)), ((), ())),
            preferred_element_type=jnp.float32)
        y_ref[b] = y                                       # full-width store


def _bn_apply_kernel(y_ref, sb_ref, o_ref):
    """out = y * scale + shift on lane-dense blocks.

    y_ref  : (bt, Cout, HW)
    sb_ref : (Cout, 2)   column 0 = rstd, column 1 = -mean * rstd
    """
    scale = sb_ref[:, 0:1][None]                           # (1, Cout, 1)
    shift = sb_ref[:, 1:2][None]
    o_ref[...] = y_ref[...] * scale + shift


def dil_conv(x_nchw, w_dw_torch, w_pw_torch, *, stride, padding, dilation,
             eps=1e-5, batch_tile=1):
    """x_nchw: (N, Cin, H, W); w_dw: (Cin,1,KH,KW); w_pw: (Cout,Cin,1,1) (torch layouts)."""
    n, cin, h, w = x_nchw.shape
    cout = w_pw_torch.shape[0]
    kh, kw = w_dw_torch.shape[2], w_dw_torch.shape[3]
    ho = (h + 2 * padding - dilation * (kh - 1) - 1) // stride + 1
    wo = (w + 2 * padding - dilation * (kw - 1) - 1) // stride + 1
    hp, wp = h + 2 * padding, w + 2 * padding
    hw = ho * wo
    assert n % batch_tile == 0, "batch must divide batch_tile"

    # --- tiny parameter glue (plain JAX on weights only) -------------------
    # Weight standardization of the 1x1 conv weights (matches the custom
    # Conv2d: mean over (Cin,1,1), std with ddof=1 like torch.std default).
    wpt = w_pw_torch.astype(jnp.float32)
    wpt = wpt - jnp.mean(wpt, axis=(1, 2, 3), keepdims=True)
    std = jnp.std(wpt.reshape(cout, -1), axis=1, ddof=1).reshape(cout, 1, 1, 1) + 1e-5
    wpt = wpt / std
    w_pw = wpt[:, :, 0, 0]                                              # (Cout, Cin)

    # Fused depthwise+pointwise effective weights: W_eff[co, (ih, iw, c)].
    w_dw = jnp.transpose(w_dw_torch.astype(jnp.float32)[:, 0], (1, 2, 0))  # (KH,KW,Cin)
    w_eff = w_dw[:, :, None, :] * w_pw[None, None, :, :]                # (KH,KW,Cout,Cin)
    w_eff = jnp.transpose(w_eff, (2, 0, 1, 3)).reshape(cout, kh * kw * cin)

    x = x_nchw.astype(jnp.float32)                                      # stays NCHW

    kernel = functools.partial(_dilconv_main_kernel, bt=batch_tile, cin=cin,
                               h=h, w=w, pad=padding, kh=kh, kw=kw,
                               stride=stride, dilation=dilation, ho=ho, wo=wo)

    # NOTE(v7x): for real LaNet shapes, add an Ho-row-tile grid axis and set
    # vmem_limit_bytes so the padded scratch + double-buffered blocks fit the
    # 32 MiB scoped / 64 MiB physical VMEM; unnecessary at these toy sizes.
    y = pl.pallas_call(
        kernel,
        out_shape=jax.ShapeDtypeStruct((n, cout, hw), jnp.float32),
        grid_spec=pltpu.PrefetchScalarGridSpec(
            num_scalar_prefetch=0,
            grid=(n // batch_tile,),
            in_specs=[pl.BlockSpec((batch_tile, cin, h, w), lambda i: (i, 0, 0, 0)),
                      pl.BlockSpec((cout, kh * kw * cin), lambda i: (0, 0))],
            out_specs=pl.BlockSpec((batch_tile, cout, hw), lambda i: (i, 0, 0)),
            scratch_shapes=[pltpu.VMEM((cin, hp, wp), jnp.float32)]),
        compiler_params=pltpu.CompilerParams(
            dimension_semantics=("parallel",)),
    )(x, w_eff)

    # --- BatchNorm2d training-mode statistics (tiny XLA reduction) ---------
    mean = jnp.mean(y, axis=(0, 2))                                     # (Cout,)
    var = jnp.mean((y - mean[None, :, None]) ** 2, axis=(0, 2))         # biased var
    rstd = jax.lax.rsqrt(var + eps)
    sb = jnp.stack([rstd, -mean * rstd], axis=1)                        # (Cout, 2)

    out_flat = pl.pallas_call(
        _bn_apply_kernel,
        out_shape=jax.ShapeDtypeStruct((n, cout, hw), jnp.float32),
        grid_spec=pltpu.PrefetchScalarGridSpec(
            num_scalar_prefetch=0,
            grid=(n // batch_tile,),
            in_specs=[pl.BlockSpec((batch_tile, cout, hw), lambda i: (i, 0, 0)),
                      pl.BlockSpec((cout, 2), lambda i: (0, 0))],
            out_specs=pl.BlockSpec((batch_tile, cout, hw), lambda i: (i, 0, 0))),
        compiler_params=pltpu.CompilerParams(
            dimension_semantics=("parallel",)),
        input_output_aliases={0: 0},                       # write BN in place over y
    )(y, sb)

    # (N, Cout, Ho*Wo) is already NCHW-contiguous; this reshape is free.
    return out_flat.reshape(n, cout, ho, wo)


def _reference(x_nchw, w_dw_t, w_pw_t, *, stride, padding, dilation, eps=1e-5):
    """Pure-JAX reference matching the PyTorch forward (training-mode BN)."""
    x = jnp.maximum(x_nchw.astype(jnp.float32), 0.0)
    y = jax.lax.conv_general_dilated(
        x, w_dw_t.astype(jnp.float32),
        window_strides=(stride, stride),
        padding=((padding, padding), (padding, padding)),
        rhs_dilation=(dilation, dilation),
        dimension_numbers=("NCHW", "OIHW", "NCHW"),
        feature_group_count=x.shape[1])
    cout = w_pw_t.shape[0]
    wpt = w_pw_t.astype(jnp.float32)
    wpt = wpt - jnp.mean(wpt, axis=(1, 2, 3), keepdims=True)
    std = jnp.std(wpt.reshape(cout, -1), axis=1, ddof=1).reshape(cout, 1, 1, 1) + 1e-5
    wpt = wpt / std
    y = jax.lax.conv_general_dilated(
        y, wpt, (1, 1), ((0, 0), (0, 0)),
        dimension_numbers=("NCHW", "OIHW", "NCHW"))
    mean = jnp.mean(y, axis=(0, 2, 3), keepdims=True)
    var = jnp.mean((y - mean) ** 2, axis=(0, 2, 3), keepdims=True)
    return (y - mean) * jax.lax.rsqrt(var + eps)


if __name__ == "__main__":
    # Small shapes consistent with the module: N=2, C_in=4, C_out=8, 16x16
    # spatial, typical DilConv config: k=3, stride=1, padding=2, dilation=2.
    N, C_IN, C_OUT, H, W = 2, 4, 8, 16, 16
    KSIZE, STRIDE, PADDING, DILATION = 3, 1, 2, 2

    key = jax.random.PRNGKey(0)
    k1, k2, k3 = jax.random.split(key, 3)
    x = jax.random.normal(k1, (N, C_IN, H, W), jnp.float32)
    w_dw = jax.random.normal(k2, (C_IN, 1, KSIZE, KSIZE), jnp.float32) * 0.2
    w_pw = jax.random.normal(k3, (C_OUT, C_IN, 1, 1), jnp.float32) * 0.2

    out = dil_conv(x, w_dw, w_pw, stride=STRIDE, padding=PADDING, dilation=DILATION)
    out = jax.block_until_ready(out)

    ref = _reference(x, w_dw, w_pw, stride=STRIDE, padding=PADDING, dilation=DILATION)
    assert out.shape == (N, C_OUT, H, W), out.shape
    max_err = float(jnp.max(jnp.abs(out - ref)))
    assert max_err < 1e-3, f"mismatch vs reference: {max_err}"

    # TODO(synk): BatchNorm2d running_mean/running_var updates are stateful and
    # not modeled (they do not affect the training-mode forward output).
    print("KERNEL_OK")
</pallas_src>

<mosaic_0001>
module attributes {stable_mosaic.version = 11 : i64} {
  func.func @_dilconv_main_kernel(%arg0: i32, %arg1: memref<1x4x16x16xf32, #tpu.memory_space<vmem>>, %arg2: memref<8x36xf32, #tpu.memory_space<vmem>>, %arg3: memref<1x8x256xf32, #tpu.memory_space<vmem>>, %arg4: memref<4x20x20xf32, #tpu.memory_space<vmem>>) attributes {dimension_semantics = [#tpu.dimension_semantics<parallel>], iteration_bounds = array<i64: 2>, scalar_prefetch = 0 : i64, scratch_operands = 1 : i64, tpu.core_type = #tpu.core_type<tc>, window_params = [{transform_indices = @transform_0, window_bounds = array<i64: 1, 4, 16, 16>}, {pipeline_mode = #tpu.pipeline_mode<synchronous>, transform_indices = @transform_1, window_bounds = array<i64: 8, 36>}, {transform_indices = @transform_2, window_bounds = array<i64: 1, 8, 256>}]} {
    %cst = arith.constant 0.000000e+00 : f32
    %0 = vector.broadcast %cst : f32 to vector<4x20x20xf32>
    %c0 = arith.constant 0 : index
    %c0_0 = arith.constant 0 : index
    %c0_1 = arith.constant 0 : index
    %1 = vector.load %arg4[%c0, %c0_0, %c0_1] : memref<4x20x20xf32, #tpu.memory_space<vmem>>, vector<4x20x20xf32>
    tpu.vector_store %arg4[%c0, %c0_0, %c0_1], %0 {strides = array<i32>} : memref<4x20x20xf32, #tpu.memory_space<vmem>>, vector<4x20x20xf32>,
    %c0_2 = arith.constant 0 : index
    %c0_3 = arith.constant 0 : index
    %c0_4 = arith.constant 0 : index
    %c0_5 = arith.constant 0 : index
    %2 = vector.load %arg1[%c0_2, %c0_3, %c0_4, %c0_5] : memref<1x4x16x16xf32, #tpu.memory_space<vmem>>, vector<1x4x16x16xf32>
    %3 = vector.shape_cast %2 : vector<1x4x16x16xf32> to vector<4x16x16xf32>
    %cst_6 = arith.constant 0.000000e+00 : f32
    %4 = vector.broadcast %cst_6 : f32 to vector<4x16x16xf32>
    %5 = arith.maximumf %3, %4 : vector<4x16x16xf32>
    %c0_7 = arith.constant 0 : index
    %c2 = arith.constant 2 : index
    %c2_8 = arith.constant 2 : index
    %6 = vector.load %arg4[%c0_7, %c2, %c2_8] : memref<4x20x20xf32, #tpu.memory_space<vmem>>, vector<4x16x16xf32>
    tpu.vector_store %arg4[%c0_7, %c2, %c2_8], %5 {strides = array<i32>} : memref<4x20x20xf32, #tpu.memory_space<vmem>>, vector<4x16x16xf32>,
    %c0_9 = arith.constant 0 : index
    %c0_10 = arith.constant 0 : index
    %c0_11 = arith.constant 0 : index
    %7 = vector.load %arg4[%c0_9, %c0_10, %c0_11] : memref<4x20x20xf32, #tpu.memory_space<vmem>>, vector<4x16x16xf32>
    %8 = vector.shape_cast %7 : vector<4x16x16xf32> to vector<4x256xf32>
    %c0_12 = arith.constant 0 : index
    %c0_13 = arith.constant 0 : index
    %c2_14 = arith.constant 2 : index
    %9 = vector.load %arg4[%c0_12, %c0_13, %c2_14] : memref<4x20x20xf32, #tpu.memory_space<vmem>>, vector<4x16x16xf32>
    %10 = vector.shape_cast %9 : vector<4x16x16xf32> to vector<4x256xf32>
    %c0_15 = arith.constant 0 : index
    %c0_16 = arith.constant 0 : index
    %c4 = arith.constant 4 : index
    %11 = vector.load %arg4[%c0_15, %c0_16, %c4] : memref<4x20x20xf32, #tpu.memory_space<vmem>>, vector<4x16x16xf32>
    %12 = vector.shape_cast %11 : vector<4x16x16xf32> to vector<4x256xf32>
    %c0_17 = arith.constant 0 : index
    %c2_18 = arith.constant 2 : index
    %c0_19 = arith.constant 0 : index
    %13 = vector.load %arg4[%c0_17, %c2_18, %c0_19] : memref<4x20x20xf32, #tpu.memory_space<vmem>>, vector<4x16x16xf32>
    %14 = vector.shape_cast %13 : vector<4x16x16xf32> to vector<4x256xf32>
    %c0_20 = arith.constant 0 : index
    %c2_21 = arith.constant 2 : index
    %c2_22 = arith.constant 2 : index
    %15 = vector.load %arg4[%c0_20, %c2_21, %c2_22] : memref<4x20x20xf32, #tpu.memory_space<vmem>>, vector<4x16x16xf32>
    %16 = vector.shape_cast %15 : vector<4x16x16xf32> to vector<4x256xf32>
    %c0_23 = arith.constant 0 : index
    %c2_24 = arith.constant 2 : index
    %c4_25 = arith.constant 4 : index
    %17 = vector.load %arg4[%c0_23, %c2_24, %c4_25] : memref<4x20x20xf32, #tpu.memory_space<vmem>>, vector<4x16x16xf32>
    %18 = vector.shape_cast %17 : vector<4x16x16xf32> to vector<4x256xf32>
    %c0_26 = arith.constant 0 : index
    %c4_27 = arith.constant 4 : index
    %c0_28 = arith.constant 0 : index
    %19 = vector.load %arg4[%c0_26, %c4_27, %c0_28] : memref<4x20x20xf32, #tpu.memory_space<vmem>>, vector<4x16x16xf32>
    %20 = vector.shape_cast %19 : vector<4x16x16xf32> to vector<4x256xf32>
    %c0_29 = arith.constant 0 : index
    %c4_30 = arith.constant 4 : index
    %c2_31 = arith.constant 2 : index
    %21 = vector.load %arg4[%c0_29, %c4_30, %c2_31] : memref<4x20x20xf32, #tpu.memory_space<vmem>>, vector<4x16x16xf32>
    %22 = vector.shape_cast %21 : vector<4x16x16xf32> to vector<4x256xf32>
    %c0_32 = arith.constant 0 : index
    %c4_33 = arith.constant 4 : index
    %c4_34 = arith.constant 4 : index
    %23 = vector.load %arg4[%c0_32, %c4_33, %c4_34] : memref<4x20x20xf32, #tpu.memory_space<vmem>>, vector<4x16x16xf32>
    %24 = vector.shape_cast %23 : vector<4x16x16xf32> to vector<4x256xf32>
    %25 = tpu.concatenate %8, %10, %12, %14, %16, %18, %20, %22, %24 in 0 : vector<4x256xf32>, vector<4x256xf32>, vector<4x256xf32>, vector<4x256xf32>, vector<4x256xf32>, vector<4x256xf32>, vector<4x256xf32>, vector<4x256xf32>, vector<4x256xf32> -> vector<36x256xf32>
    %c0_35 = arith.constant 0 : index
    %c0_36 = arith.constant 0 : index
    %26 = vector.load %arg2[%c0_35, %c0_36] : memref<8x36xf32, #tpu.memory_space<vmem>>, vector<8x36xf32>
    %cst_37 = arith.constant dense<0.000000e+00> : vector<8x256xf32>
    %27 = tpu.matmul %26, %25, %cst_37 {dimension_numbers = #tpu.dot_dimension_numbers<[1], [0], [0], [1], [0, 0, 1, 1], [], []>} : vector<8x36xf32>, vector<36x256xf32>, vector<8x256xf32> -> vector<8x256xf32>
    %c0_38 = arith.constant 0 : index
    %c0_39 = arith.constant 0 : index
    %c0_40 = arith.constant 0 : index
    %28 = vector.load %arg3[%c0_38, %c0_39, %c0_40] : memref<1x8x256xf32, #tpu.memory_space<vmem>>, vector<1x8x256xf32>
    %29 = vector.shape_cast %28 : vector<1x8x256xf32> to vector<8x256xf32>
    %30 = vector.shape_cast %27 : vector<8x256xf32> to vector<1x8x256xf32>
    tpu.vector_store %arg3[%c0_38, %c0_39, %c0_40], %30 {strides = array<i32>} : memref<1x8x256xf32, #tpu.memory_space<vmem>>, vector<1x8x256xf32>,
    return
  }
  func.func @transform_0(%arg0: i32) -> (i32, i32, i32, i32) {
    %c0_i32 = arith.constant 0 : i32
    %c0_i32_0 = arith.constant 0 : i32
    %c0_i32_1 = arith.constant 0 : i32
    %c0_i32_2 = arith.constant 0 : i32
    return %arg0, %c0_i32, %c0_i32_0, %c0_i32_1 : i32, i32, i32, i32
  }
  func.func @transform_1(%arg0: i32) -> (i32, i32) {
    %c0_i32 = arith.constant 0 : i32
    %c0_i32_0 = arith.constant 0 : i32
    %c0_i32_1 = arith.constant 0 : i32
    return %c0_i32, %c0_i32_0 : i32, i32
  }
  func.func @transform_2(%arg0: i32) -> (i32, i32, i32) {
    %c0_i32 = arith.constant 0 : i32
    %c0_i32_0 = arith.constant 0 : i32
    %c0_i32_1 = arith.constant 0 : i32
    return %arg0, %c0_i32, %c0_i32_0 : i32, i32, i32
  }
}

</mosaic_0001>

<bundles_post_ra>
// kernel: tpu_custom_call.1
= control target key start
LH: loop header
LB: loop body
LE: loop exit
PB: predicated region body
PF: predicated region fallthrough
CT: control target
= control target key end

     0   :  { %7 = vsyncpa [#allocation4], 0  ;;  %s4809_s0 = inlined_call_operand.hbm [shape: f32[2,4,16,16], index: 0, kind: input, shape index: {}]   ;;  %s4810_s1 = inlined_call_operand.hbm [shape: f32[8,36], index: 1, kind: input, shape index: {}]   ;;  %s4811_s2 = inlined_call_operand.hbm [shape: f32[2,8,256], index: 2, kind: output, shape index: {}]  }
   0x1   :  { %9 = vsyncpa [#allocation4 + $0x1], 0 }
   0x2   :  { %10 = vsyncpa [#allocation7], 0 }
   0x3   :  { %11 = vsyncpa [#allocation5], 0 }
   0x4   :  { %13 = vsyncpa [#allocation5 + $0x1], 0  ;;  %s3079_s9 = smov 0   ;;  %s3081_s10 = smov 0  }
   0x5   :  { %s3083_s11 = smov 0   ;;  %s3085_s12 = smov 0  }
   0x6 LB: > { %s3100_s13 = sadd.s32 4294967295, %s3044_s12   ;;  %s2511_s14 = sadd.s32 4294967294, %s3044_s12   ;;  %s3044_s12 = sphi %s3085_s12, %s5034_s12   ;;  %s3040_s11 = sphi %s3083_s11, %s5033_s11   ;;  %s3036_s10 = sphi %s3081_s10, %s5032_s10   ;;  %s3032_s9 = sphi %s3079_s9, %s5031_s9  }
   0x7   : > { %s3104_s15 = sadd.s32 1, %s3044_s12   ;;  %s26_s16 = sadd.s32 1, %s3040_s11 }
   0x8   : > { %s23_s17 = ssub.s32 %s3044_s12, %s3104_s15  ;;  %p33_p0 = scmp.ne.s32.totalorder %s3040_s11, %s3036_s10 }
   0x9   : > { %p24_p1 = scmp.eq.s32.totalorder %s23_s17, 0  ;;  %p34_p2 = scmp.eq.s32.totalorder %s3044_s12, 0 }
   0xa   : > { %p39_p3 = scmp.ne.s32.totalorder %s3036_s10, %s3032_s9  ;;  %p4812_p4 = scmp.eq.s32.totalorder %s3100_s13, 0 }
   0xb   : > { %s3116_s18 = scalar_select %p24_p1, %s3040_s11, %s26_s16  }
   0xc   : > { %p3118_p5 = por %p34_p2, %p33_p0  ;;  %p3124_p6 = por %p4812_p4, %p39_p3 }
   0xd   : > { %p84_p7 = scmp.eq.s32.totalorder %s3100_s13, 1  ;;  %p90_p8 = scmp.eq.s32.totalorder %s2511_s14, 1 }
   0xe   : > { %s4868_s20 = scalar_select %p3124_p6, 1, 0 }
   0xf   : > { %p2512_p9 = scmp.ge.s32.totalorder %s3044_s12, 1  ;;  %p97_p10 = scmp.lt.s32.totalorder %s3044_s12, 3 }
  0x10   : > { %p3131_p11 = por %p84_p7, %p33_p0  ;;  %p3135_p12 = por %p90_p8, %p39_p3 }
  0x11   : > { %p3139_p13 = pnand %p2512_p9, %p97_p10  ;;  %s3046_s24 = smov [#allocation6]  }
  0x12   : > { %s4869_s21 = scalar_select %p3131_p11, 1, 0 }
  0x13   : > { %s4870_s22 = scalar_select %p3135_p12, 1, 0 }
  0x14   : > { %s4871_s23 = scalar_select %p3139_p13, 1, 0 }
  0x15   : > { %p2548_p2 = pneg %p3139_p13  ;;  %s110_s25 = sshll.u32 %s3046_s24, 4  ;;  %s111_s25 = int_to_ptr.vmem [resolvable:$true] %s110_s25 }
  0x16   : > { %p2561_p4 = scmp.lt.s32.totalorder %s3044_s12, 2  ;;  %p4872_p0 = scmp.eq.s32.totalorder %s3100_s13, 0 }
  0x17   : > { %s121_s27 = sand.u32 1, %s3040_s11   ;;  %s2916_s4 = scalar_lea.hbm %s4810_s1, 128 }
  0x18   : > { %p3149_p7 = pnand %p2548_p2, %p4872_p0  ;;  %p3156_p3 = pnand %p2561_p4, %p3118_p5 }
  0x19   : > { %s2515_s29 = sshll.u32 %s121_s27, 6  ;;  %p2917_p8 = scmp.ne.s32.totalorder %s4810_s1, %s2916_s4 }
  0x1a   : > { %s4874_s28 = scalar_select %p3156_p3, 1, 0 }
  0x1b   : > { %p2918_p9 = pneg %p3149_p7  ;;  %p2923_p4 = scmp.lt.u32.totalorder %s2916_s4, %s4810_s1 }
  0x1d   : > { %p2919_p10 = pnand %p2918_p9, %p2917_p8 }
  0x1f   : > { %p2920_p2 = pneg %p2919_p10 }
  0x21   : > { %p2925_p5 = pnand %p2923_p4, %p2920_p2 }
  0x23   : > { %2928 = shalt.err (!%p2925_p5)
}
  0x24   : > { %s2929_s14 = scalar_lea.vmem %s111_s25, 128  ;;  %p2937_p11 = scmp.lt.s32.totalorder %s111_s25, %s111_s25 }
  0x25   : > { %p2930_p0 = scmp.ne.s32.totalorder %s111_s25, %s2929_s14  ;;  %p2938_p6 = scmp.lt.s32.totalorder %s2929_s14, %s2929_s14 }
  0x27   : > { %p2932_p1 = pnand %p2930_p0, %p2918_p9  ;;  %p2939_p13 = por %p2938_p6, %p2937_p11 }
  0x29   : > { %p2933_p12 = pneg %p2932_p1 }
  0x2b   : > { %p2940_p3 = pnand %p2939_p13, %p2933_p12 }
  0x2d   : > { %2943 = shalt.err (!%p2940_p3)
}
  0x2e   : > { %2551 = dma.hbm_to_vmem [thread:$0]  (!%p3149_p7), %s4810_s1, 128, %s111_s25, [#allocation7]  }
  0x2f   : > { %s2530_s19 = sshll.u32 %s3044_s12, 10  ;;  %s125_s24 = scalar_lea.vmem [#allocation3], %s2515_s29 }
  0x30   : > { %s132_s30 = sshll.u32 %s125_s24, 4  ;;  %s3180_s5 = scalar_lea.hbm %s4809_s0, %s2530_s19  ;;  %s3182_s30 = int_to_ptr.vmem [resolvable:$true] %s132_s30 }
  0x31   : > { %s3184_s26 = scalar_lea.sflag [#allocation4], %s121_s27  ;;  %s2944_s6 = scalar_lea.hbm %s3180_s5, 1024 }
  0x32   : > { %p2945_p6 = scmp.ne.s32.totalorder %s3180_s5, %s2944_s6  ;;  %p4875_p11 = scmp.ne.s32.totalorder %s4874_s28, 0 }
  0x33   : > { %s2949_s7 = scalar_lea.hbm %s4809_s0, 2048  ;;  %p2950_p7 = scmp.lt.u32.totalorder %s3180_s5, %s4809_s0 }
  0x34   : > { %p2946_p12 = pneg %p4875_p11  ;;  %p2951_p3 = scmp.lt.u32.totalorder %s2949_s7, %s2944_s6 }
  0x35   : > { %p2953_p9 = scmp.lt.u32.totalorder %s2944_s6, %s3180_s5 }
  0x36   : > { %p2947_p13 = pnand %p2946_p12, %p2945_p6  ;;  %p2952_p8 = por %p2951_p3, %p2950_p7 }
  0x38   : > { %p2948_p1 = pneg %p2947_p13  ;;  %p2954_p10 = por %p2953_p9, %p2952_p8 }
  0x3a   : > { %p2955_p2 = pnand %p2954_p10, %p2948_p1 }
  0x3c   : > { %2958 = shalt.err (!%p2955_p2)
}
  0x3d   : > { %s2959_s27 = scalar_lea.vmem %s3182_s30, 1024  ;;  %s3047_s16 = smov [#allocation3]  }
  0x3e   : > { %p2960_p4 = scmp.ne.s32.totalorder %s3182_s30, %s2959_s27  ;;  %s2964_s17 = sshll.u32 %s3047_s16, 4  ;;  %s2965_s17 = int_to_ptr.vmem [resolvable:$false] %s2964_s17 }
  0x3f   : > { %s2966_s19 = scalar_lea.vmem %s2965_s17, 2048  ;;  %p2967_p6 = scmp.lt.s32.totalorder %s3182_s30, %s2965_s17 }
  0x40   : > { %p2962_p5 = pnand %p2960_p4, %p2946_p12  ;;  %p2968_p13 = scmp.lt.s32.totalorder %s2966_s19, %s2959_s27 }
  0x42   : > { %p2963_p0 = pneg %p2962_p5  ;;  %p2969_p7 = por %p2968_p13, %p2967_p6 }
  0x44   : > { %p2970_p3 = pnand %p2969_p7, %p2963_p0 }
  0x46   : > { %2973 = shalt.err (!%p2970_p3)
}
  0x47   : > { %s3048_s24 = smov 128   ;;  %s3049_s3 = smov 8  }
  0x48   : > { %2555 = dma.hbm_to_vmem [thread:$0]  (!%p4875_p11), %s3180_s5, 1024, %s3182_s30, %s3184_s26, %s3048_s24, %s3048_s24, %s3049_s3  }
  0x49   : > { %p4876_p12 = scmp.ne.s32.totalorder %s4871_s23, 0 }
  0x4b   : > { %144 = sbr.rel (%p4876_p12) target bundleno = 880 (0x370), region = 28 }
  0x52   : > { %s3215_s4 = sand.u32 1, %s3036_s10   ;;  %p4877_p1 = scmp.ne.s32.totalorder %s4868_s20, 0 }
  0x53   : > { %s2519_s6 = sshll.u32 %s3215_s4, 6  ;;  %s147_s25 = scalar_lea.sflag [#allocation4], %s3215_s4 }
  0x54   : > { %s3219_s29 = scalar_lea.vmem [#allocation3], %s2519_s6 }
  0x55   : > { %3019 = dma.done.wait (%p4877_p1), %s147_s25, 1024  }
  0x56   : > { %3021 = vsyncadd (%p4877_p1), %s147_s25, 4294966272  ;;  %p4878_p11 = scmp.eq.s32.totalorder %s3100_s13, 0 }
  0x58   : > { %3023 = dma.done.wait (%p4878_p11), [#allocation7], 128   ;;  %p4879_p8 = pmov %p4878_p11 }
  0x59   : > { %vm175_vm0 = vcmask 162816   ;;  %v4817_v0 = vmov 0.0   ;;  %vm178_vm1 = vcmask 158720   ;;  %v191_v1 = vld [vmem:[%s3219_s29 + $0x10] sm:$0xff]  ;;  %v189_v2 = vld [vmem:[%s3219_s29] sm:$0xff]  ;;  %v192_v3 = vld [vmem:[%s3219_s29 + $0x18] sm:$0xff]  ;;  %v259_v25 = vlaneseq }
  0x5a   : > { %3025 = vsyncadd (%p4879_p8), [#allocation7], 4294967168  ;;  %180 = vst.msk [vmem:[#allocation2 + $0x18] sm:$0xff] %vm175_vm0, %v4817_v0  ;;  %2407 = vmatprep.mubr.f32.mxu0 %v4817_v0  ;;  %v199_v4 = vmax.f32 %v191_v1, 0.0  ;;  %v197_v5 = vmax.f32 %v189_v2, 0.0  ;;  %v190_v6 = vld [vmem:[%s3219_s29 + $0x8] sm:$0xff] }
  0x5b   : > { %181 = vst.msk [vmem:[#allocation2 + $0x20] sm:$0xff] %vm175_vm0, %v4817_v0  ;;  %176 = vst.msk [vmem:[#allocation2] sm:$0xff] %vm175_vm0, %v4817_v0  ;;  %s3051_s20 = smov 2   ;;  %v200_v7 = vmax.f32 %v192_v3, 0.0  ;;  %v198_v8 = vmax.f32 %v190_v6, 0.0  ;;  %v194_v9 = vld [vmem:[%s3219_s29 + $0x28] sm:$0xff] }
  0x5c   : > { %177 = vst.msk [vmem:[#allocation2 + $0x8] sm:$0xff] %vm175_vm0, %v4817_v0  ;;  %183 = vst.msk [vmem:[#allocation2 + $0x30] sm:$0xff] %vm175_vm0, %v4817_v0  ;;  %217 = vrot.lane.b32.xlu1 %v199_v4, %s3051_s20  ;;  %213 = vrot.lane.b32.xlu0 %v197_v5, %s3051_s20  ;;  %v193_v10 = vld [vmem:[%s3219_s29 + $0x20] sm:$0xff]  ;;  %v202_v11 = vmax.f32 %v194_v9, 0.0  ;;  %v196_v13 = vld [vmem:[%s3219_s29 + $0x38] sm:$0xff]  ;;  %vm237_vm2 = vcmask 146448  }
  0x5d   : > { %184 = vst.msk [vmem:[#allocation2 + $0x38] sm:$0xff] %vm175_vm0, %v4817_v0  ;;  %186 = vst.msk [vmem:[#allocation2 + $0x48] sm:$0xff] %vm175_vm0, %v4817_v0  ;;  %v201_v12 = vmax.f32 %v193_v10, 0.0  ;;  %v195_v14 = vld [vmem:[%s3219_s29 + $0x30] sm:$0xff]  ;;  %v204_v15 = vmax.f32 %v196_v13, 0.0  ;;  %s3053_s23 = smov 126  }
  0x5e   : > { %187 = vst.msk [vmem:[#allocation2 + $0x50] sm:$0xff] %vm175_vm0, %v4817_v0  ;;  %v203_v16 = vmax.f32 %v195_v14, 0.0  ;;  %v3052_v23 = vmov 1983009808   ;;  %v3266_v31 = vshrl.u32 %v259_v25, 7  ;;  %s3054_s28 = smov 124  }
  0x5f   : > { %182 = vst.msk [vmem:[#allocation2 + $0x28] sm:$0xf] %vm178_vm1, %v4817_v0  ;;  %179 = vst.msk [vmem:[#allocation2 + $0x10] sm:$0xf] %vm178_vm1, %v4817_v0  ;;  %v257_v24 = vunpack.c.l.s4 %v3052_v23  ;;  %s3056_s30 = smov 32   ;;  %s3057_s5 = smov 64  }
  0x60   : > { %185 = vst.msk [vmem:[#allocation2 + $0x40] sm:$0xf] %vm178_vm1, %v4817_v0  ;;  %188 = vst.msk [vmem:[#allocation2 + $0x58] sm:$0xf] %vm178_vm1, %v4817_v0  ;;  %219 = vrot.lane.b32.xlu1 %v200_v7, %s3051_s20  ;;  %215 = vrot.lane.b32.xlu0 %v198_v8, %s3051_s20  ;;  %s3058_s26 = smov 96   ;;  %s3059_s7 = smov 16  }
  0x61   : > { %v258_v30 = vunpack.c.0.s8 %v257_v24  ;;  %s3060_s8 = smov 48   ;;  %s3061_s14 = smov 80   ;;  %vm446_vm3 = vcmask 130048   ;;  %vm448_vm4 = vcmask 261120   ;;  %vm450_vm5 = vcmask 392192  }
  0x62   : > { %s3062_s27 = smov 112   ;;  %vm452_vm6 = vcmask 523264   ;;  %vm454_vm7 = vcmask 654336   ;;  %vm456_vm8 = vcmask 785408   ;;  %vm458_vm9 = vcmask 916480   ;;  %s2521_s16 = sshll.u32 %s3215_s4, 4 }
  0x63   : > { %v3295_v44 = vsub.s32 %v258_v30, %v3266_v31  ;;  %vm2323_vm10 = vcmask 1043456   ;;  %vm2333_vm11 = vcmask 293888   ;;  %s174_s17 = scalar_lea.vmem [#allocation8], %s2521_s16  ;;  %s2531_s24 = sshll.u32 %s3100_s13, 8 }
  0x64   : > { %223 = vrot.lane.b32.xlu1 %v202_v11, %s3051_s20  ;;  %221 = vrot.lane.b32.xlu0 %v201_v12, %s3051_s20  ;;  %s2431_s19 = sshll.u32 %s174_s17, 4  ;;  %s4767_s25 = scalar_lea.hbm %s4811_s2, %s2531_s24  ;;  %s4762_s19 = int_to_ptr.vmem [resolvable:$true] %s2431_s19 }
  0x65   : > { %s2417_s29 = scalar_lea.sflag [#allocation5], %s3215_s4  ;;  %p5028_p10 = scmp.ne.s32.totalorder %s4869_s21, 0 }
  0x66   : > { %s3063_s13 = smov [#allocation8]  }
  0x68   : > { %227 = vrot.lane.b32.xlu1 %v204_v15, %s3051_s20  ;;  %225 = vrot.lane.b32.xlu0 %v203_v16, %s3051_s20  ;;  %s2974_s20 = scalar_lea.vmem %s4762_s19, 256 }
  0x69   : > { %p2975_p9 = scmp.ne.s32.totalorder %s4762_s19, %s2974_s20 }
  0x6b   : > { %p2976_p2 = pnand %p2975_p9, %p5028_p10 }
  0x6d   : > { %p2977_p4 = pneg %p2976_p2 }
  0xce   : > { %v218_v17 = vpop.permute.xlu1 %217  ;;  %v214_v18 = vpop.permute.xlu0 %213 }
  0xcf   : > { %240 = vst.msk [vmem:[#allocation2 + $0x1a] sm:$0xff] %vm237_vm2, %v218_v17  ;;  %238 = vst.msk [vmem:[#allocation2 + $0x2] sm:$0xff] %vm237_vm2, %v214_v18 }
  0xd2   : > { %v220_v19 = vpop.permute.xlu1 %219  ;;  %v216_v20 = vpop.permute.xlu0 %215 }
  0xd3   : > { %241 = vst.msk [vmem:[#allocation2 + $0x22] sm:$0xff] %vm237_vm2, %v220_v19  ;;  %239 = vst.msk [vmem:[#allocation2 + $0xa] sm:$0xff] %vm237_vm2, %v216_v20 }
  0xd6   : > { %v224_v21 = vpop.permute.xlu1 %223  ;;  %v222_v22 = vpop.permute.xlu0 %221  ;;  %v3268_v32 = vld [vmem:[#allocation2] sm:$0xff]  ;;  %v3297_v45 = vld [vmem:[#allocation2 + $0x18] sm:$0xff] }
  0xd7   : > { %243 = vst.msk [vmem:[#allocation2 + $0x3a] sm:$0xff] %vm237_vm2, %v224_v21  ;;  %242 = vst.msk [vmem:[#allocation2 + $0x32] sm:$0xff] %vm237_vm2, %v222_v22  ;;  %v3363_v9 = vld [vmem:[#allocation2 + $0x2] sm:$0xff]  ;;  %v3374_v12 = vld [vmem:[#allocation2 + $0x1a] sm:$0xff] }
  0xda   : > { %v228_v26 = vpop.permute.xlu1 %227  ;;  %v226_v27 = vpop.permute.xlu0 %225  ;;  %v3256_v28 = vld [vmem:[#allocation2 + $0x20] sm:$0xff]  ;;  %v3258_v29 = vld [vmem:[#allocation2 + $0x8] sm:$0xff] }
  0xdb   : > { %245 = vst.msk [vmem:[#allocation2 + $0x52] sm:$0xff] %vm237_vm2, %v228_v26  ;;  %244 = vst.msk [vmem:[#allocation2 + $0x4a] sm:$0xff] %vm237_vm2, %v226_v27  ;;  %481 = vrot.lane.b32.xlu1 %v3256_v28, %s3053_s23  ;;  %477 = vrot.lane.b32.xlu0 %v3258_v29, %s3053_s23  ;;  %v3286_v40 = vld [vmem:[#allocation2 + $0xa] sm:$0xff]  ;;  %v3319_v54 = vld [vmem:[#allocation2 + $0x22] sm:$0xff] }
  0xdc   : > { %v3299_v46 = vld [vmem:[#allocation2 + $0xc] sm:$0xff]  ;;  %v3321_v55 = vld [vmem:[#allocation2 + $0x24] sm:$0xff]  ;;  %v3388_v19 = vld [vmem:[#allocation2 + $0x1c] sm:$0xff] }
  0xdd   : > { %v3380_v15 = vld [vmem:[#allocation2 + $0x4] sm:$0xff] }
  0xde   : > { %v3270_v33 = vld [vmem:[#allocation2 + $0x38] sm:$0xff]  ;;  %v3272_v34 = vld [vmem:[#allocation2 + $0x30] sm:$0xff] }
  0xdf   : > { %v3274_v35 = vld [vmem:[#allocation2 + $0x3a] sm:$0xff]  ;;  %485 = vrot.lane.b32.xlu0 %v3270_v33, %s3053_s23  ;;  %v322_v36 = vcombine.low %v3258_v29, %v3270_v33  ;;  %v323_v37 = vcombine.high %v3258_v29, %v3270_v33  ;;  %v254_v38 = vcombine.low %v3268_v32, %v3272_v34  ;;  %v255_v39 = vcombine.high %v3268_v32, %v3272_v34  ;;  %v3333_v61 = vld [vmem:[#allocation2 + $0x32] sm:$0xff] }
  0xe0   : > { %v3288_v41 = vld [vmem:[#allocation2 + $0x3c] sm:$0xff]  ;;  %v1011_v42 = vcombine.low %v3286_v40, %v3274_v35  ;;  %v1012_v43 = vcombine.high %v3286_v40, %v3274_v35  ;;  %v3349_v4 = vld [vmem:[#allocation2 + $0x34] sm:$0xff]  ;;  %v943_v13 = vcombine.low %v3363_v9, %v3333_v61  ;;  %v944_v14 = vcombine.high %v3363_v9, %v3333_v61 }
  0xe1   : > { %v1693_v50 = vcombine.low %v3299_v46, %v3288_v41  ;;  %v3336_v62 = vrot.slane %v322_v36, %v3295_v44  ;;  %v3339_v63 = vrot.slane %v254_v38, %v3295_v44  ;;  %v3342_v1 = vrot.slane %v255_v39, %v3295_v44 }
  0xe2   : > { %v3301_v47 = vld [vmem:[#allocation2 + $0x50] sm:$0xff]  ;;  %v3303_v48 = vld [vmem:[#allocation2 + $0x48] sm:$0xff]  ;;  %v3345_v2 = vrot.slane %v1011_v42, %v3295_v44  ;;  %v1625_v20 = vcombine.low %v3380_v15, %v3349_v4  ;;  %v3399_v23 = vrot.slane %v1012_v43, %v3295_v44  ;;  %v3407_v26 = vrot.slane %v943_v13, %v3295_v44 }
  0xe3   : > { %v3305_v49 = vld [vmem:[#allocation2 + $0x52] sm:$0xff]  ;;  %489 = vrot.lane.b32.xlu1 %v3301_v47, %s3053_s23  ;;  %v338_v51 = vcombine.low %v3256_v28, %v3301_v47  ;;  %v339_v52 = vcombine.high %v3256_v28, %v3301_v47  ;;  %475 = vrot.lane.b32.xlu0 %v3268_v32, %s3053_s23  ;;  %v270_v53 = vcombine.low %v3297_v45, %v3303_v48  ;;  %v3347_v3 = vld [vmem:[#allocation2 + $0x4a] sm:$0xff] }
  0xe4   : > { %v3323_v56 = vld [vmem:[#allocation2 + $0x54] sm:$0xff]  ;;  %v271_v57 = vcombine.high %v3297_v45, %v3303_v48  ;;  %v1027_v58 = vcombine.low %v3319_v54, %v3305_v49  ;;  %v1028_v59 = vcombine.high %v3319_v54, %v3305_v49  ;;  %4880 = vst [vmem:[#allocation12_spill] sm:$0xff] %v3336_v62  ;;  %v3358_v7 = vrot.slane %v1693_v50, %v3295_v44  ;;  %v3365_v10 = vld [vmem:[#allocation2 + $0x4c] sm:$0xff] }
  0xe5   : > { %v1709_v60 = vcombine.low %v3321_v55, %v3323_v56  ;;  %v3352_v5 = vrot.slane %v338_v51, %v3295_v44  ;;  %v959_v17 = vcombine.low %v3374_v12, %v3347_v3  ;;  %v960_v18 = vcombine.high %v3374_v12, %v3347_v3 }
  0xe6   : > { %v3355_v6 = vrot.slane %v1027_v58, %v3295_v44  ;;  %4882 = vst [vmem:[#allocation14_spill] sm:$0xff] %v3358_v7  ;;  %v3372_v11 = vrot.slane %v1028_v59, %v3295_v44  ;;  %v3393_v21 = vrot.slane %v270_v53, %v3295_v44  ;;  %v3396_v22 = vrot.slane %v271_v57, %v3295_v44 }
  0xe7   : > { %4881 = vst [vmem:[#allocation13_spill] sm:$0xff] %v3352_v5  ;;  %v3361_v8 = vrot.slane %v1709_v60, %v3295_v44  ;;  %479 = vrot.lane.b32.xlu1 %v3297_v45, %s3053_s23  ;;  %483 = vrot.lane.b32.xlu0 %v3272_v34, %s3053_s23  ;;  %v1641_v24 = vcombine.low %v3388_v19, %v3365_v10 }
  0xe8   : > { %v3404_v25 = vrot.slane %v339_v52, %v3295_v44  ;;  %v3410_v27 = vrot.slane %v959_v17, %v3295_v44  ;;  %v3413_v30 = vrot.slane %v960_v18, %v3295_v44  ;;  %v3420_v36 = vrot.slane %v1625_v20, %v3295_v44 }
  0xe9   : > { %4883 = vst [vmem:[#allocation15_spill] sm:$0xff] %v3361_v8  ;;  %v3423_v38 = vrot.slane %v1641_v24, %v3295_v44  ;;  %v1044_v39 = vcombine.high %v3345_v2, %v3355_v6  ;;  %v3428_v42 = vrot.slane %v944_v14, %v3295_v44  ;;  %v355_v50 = vcombine.high %v3336_v62, %v3352_v5 }
  0xea   : > { %4884 = vst [vmem:[#allocation16_spill] sm:$0xff] %v3420_v36  ;;  %v976_v43 = vcombine.high %v3407_v26, %v3410_v27  ;;  %v3446_v58 = vrot.slane %v323_v37, %v3295_v44 }
  0xeb   : > { %487 = vrot.lane.b32.xlu1 %v3303_v48, %s3053_s23  ;;  %707 = vrot.lane.b32.xlu0 %v3258_v29, %s3054_s28  ;;  %4885 = vst [vmem:[#allocation17_spill] sm:$0xff] %v3423_v38 }
  0xef   : > { %711 = vrot.lane.b32.xlu1 %v3256_v28, %s3054_s28  ;;  %715 = vrot.lane.b32.xlu0 %v3270_v33, %s3054_s28 }
  0xf3   : > { %719 = vrot.lane.b32.xlu1 %v3301_v47, %s3054_s28  ;;  %705 = vrot.lane.b32.xlu0 %v3268_v32, %s3054_s28 }
  0xf7   : > { %709 = vrot.lane.b32.xlu1 %v3297_v45, %s3054_s28  ;;  %713 = vrot.lane.b32.xlu0 %v3272_v34, %s3054_s28 }
  0xfb   : > { %717 = vrot.lane.b32.xlu1 %v3303_v48, %s3054_s28  ;;  %1389 = vrot.lane.b32.xlu0 %v3286_v40, %s3054_s28 }
  0xff   : > { %1393 = vrot.lane.b32.xlu1 %v3319_v54, %s3054_s28  ;;  %1397 = vrot.lane.b32.xlu0 %v3274_v35, %s3054_s28 }
 0x103   : > { %1401 = vrot.lane.b32.xlu1 %v3305_v49, %s3054_s28  ;;  %1841 = vrot.lane.b32.xlu0 %v3299_v46, %s3053_s23 }
 0x107   : > { %1845 = vrot.lane.b32.xlu1 %v3321_v55, %s3053_s23  ;;  %1849 = vrot.lane.b32.xlu0 %v3288_v41, %s3053_s23 }
 0x10b   : > { %1853 = vrot.lane.b32.xlu1 %v3323_v56, %s3053_s23  ;;  %1387 = vrot.lane.b32.xlu0 %v3363_v9, %s3054_s28 }
 0x10f   : > { %1391 = vrot.lane.b32.xlu1 %v3374_v12, %s3054_s28  ;;  %1395 = vrot.lane.b32.xlu0 %v3333_v61, %s3054_s28 }
 0x113   : > { %1399 = vrot.lane.b32.xlu1 %v3347_v3, %s3054_s28  ;;  %1839 = vrot.lane.b32.xlu0 %v3380_v15, %s3053_s23 }
 0x117   : > { %1843 = vrot.lane.b32.xlu1 %v3388_v19, %s3053_s23  ;;  %1847 = vrot.lane.b32.xlu0 %v3349_v4, %s3053_s23 }
 0x11b   : > { %1851 = vrot.lane.b32.xlu1 %v3365_v10, %s3053_s23  ;;  %1159 = vrot.lane.b32.xlu0 %v3286_v40, %s3053_s23 }
 0x11f   : > { %1163 = vrot.lane.b32.xlu1 %v3319_v54, %s3053_s23  ;;  %1167 = vrot.lane.b32.xlu0 %v3274_v35, %s3053_s23  ;;  %v3055_v35 = vmov 1934713408  }
 0x120   : > { %v289_v40 = vunpack.c.l.s4 %v3055_v35 }
 0x123   : > { %1171 = vrot.lane.b32.xlu1 %v3305_v49, %s3053_s23  ;;  %1157 = vrot.lane.b32.xlu0 %v3363_v9, %s3053_s23  ;;  %v290_v49 = vunpack.c.0.s8 %v289_v40 }
 0x125   : > { %v3553_v18 = vsub.s32 %v290_v49, %v3266_v31 }
 0x127   : > { %1161 = vrot.lane.b32.xlu1 %v3374_v12, %s3053_s23  ;;  %1165 = vrot.lane.b32.xlu0 %v3333_v61, %s3053_s23 }
 0x12b   : > { %1169 = vrot.lane.b32.xlu1 %v3347_v3, %s3053_s23  ;;  %2071 = vrot.lane.b32.xlu0 %v3299_v46, %s3054_s28  ;;  %s2978_s23 = sshll.u32 %s3063_s13, 4  ;;  %s2979_s23 = int_to_ptr.vmem [resolvable:$false] %s2978_s23 }
 0x12c   : > { %p2981_p5 = scmp.lt.s32.totalorder %s4762_s19, %s2979_s23 }
 0x12f   : > { %2075 = vrot.lane.b32.xlu1 %v3321_v55, %s3054_s28  ;;  %2079 = vrot.lane.b32.xlu0 %v3288_v41, %s3054_s28 }
 0x133   : > { %2083 = vrot.lane.b32.xlu1 %v3323_v56, %s3054_s28  ;;  %2069 = vrot.lane.b32.xlu0 %v3380_v15, %s3054_s28 }
 0x137   : > { %2073 = vrot.lane.b32.xlu1 %v3388_v19, %s3054_s28  ;;  %2077 = vrot.lane.b32.xlu0 %v3349_v4, %s3054_s28 }
 0x13b   : > { %2081 = vrot.lane.b32.xlu1 %v3365_v10, %s3054_s28  ;;  %s2980_s28 = scalar_lea.vmem %s2979_s23, 512 }
 0x13c   : > { %p2982_p0 = scmp.lt.s32.totalorder %s2980_s28, %s2974_s20 }
 0x13e   : > { %p2983_p6 = por %p2982_p0, %p2981_p5 }
 0x140   : > { %p2984_p13 = pnand %p2983_p6, %p2977_p4 }
 0x14d   : > { %v478_v34 = vpop.permute.xlu0 %477  ;;  %v482_v45 = vpop.permute.xlu1 %481 }
 0x151   : > { %v486_v47 = vpop.permute.xlu0 %485 }
 0x152   : > { %v567_v48 = vcombine.low %v478_v34, %v486_v47  ;;  %v568_v14 = vcombine.high %v478_v34, %v486_v47 }
 0x154   : > { %v3547_v9 = vrot.slane %v567_v48, %v3295_v44  ;;  %v3566_v48 = vrot.slane %v1044_v39, %v3553_v18  ;;  %v3596_v34 = vrot.slane %v568_v14, %v3295_v44 }
 0x155   : > { %v490_v54 = vpop.permute.xlu1 %489  ;;  %v476_v61 = vpop.permute.xlu0 %475 }
 0x156   : > { %v583_v3 = vcombine.low %v482_v45, %v490_v54  ;;  %4887 = vst [vmem:[#allocation19_spill] sm:$0xff] %v3566_v48 }
 0x158   : > { %v3550_v12 = vrot.slane %v583_v3, %v3295_v44 }
 0x159   : > { %v480_v20 = vpop.permute.xlu1 %479  ;;  %v484_v24 = vpop.permute.xlu0 %483 }
 0x15a   : > { %v600_v40 = vcombine.high %v3547_v9, %v3550_v12  ;;  %v499_v52 = vcombine.low %v476_v61, %v484_v24  ;;  %v500_v57 = vcombine.high %v476_v61, %v484_v24 }
 0x15c   : > { %v3560_v16 = vrot.slane %v600_v40, %v3553_v18  ;;  %v3571_v17 = vrot.slane %v499_v52, %v3295_v44  ;;  %v584_v40 = vcombine.high %v482_v45, %v490_v54 }
 0x15d   : > { %v488_v31 = vpop.permute.xlu1 %487  ;;  %v708_v49 = vpop.permute.xlu0 %707 }
 0x15e   : > { %4886 = vst [vmem:[#allocation18_spill] sm:$0xff] %v3560_v16  ;;  %v515_v3 = vcombine.low %v480_v20, %v488_v31  ;;  %v2612_v32 = vpack.i.bf16 %v3566_v48, %v3560_v16 }
 0x160   : > { %v3574_v33 = vrot.slane %v515_v3, %v3295_v44  ;;  %2613 = vrot.lane.b32.xlu0 %v2612_v32, %s3056_s30  ;;  %v3588_v3 = vrot.slane %v976_v43, %v3553_v18  ;;  %v3591_v32 = vrot.slane %v584_v40, %v3295_v44  ;;  %v516_v40 = vcombine.high %v480_v20, %v488_v31 }
 0x161   : > { %v712_v28 = vpop.permute.xlu1 %711  ;;  %v716_v35 = vpop.permute.xlu0 %715 }
 0x162   : > { %v532_v0 = vcombine.high %v3571_v17, %v3574_v33  ;;  %v797_v37 = vcombine.low %v708_v49, %v716_v35  ;;  %v615_v43 = vcombine.low %v3596_v34, %v3591_v32  ;;  %v530_v20 = vrot.slane %v516_v40, %v3295_v44 }
 0x164   : > { %v3582_v52 = vrot.slane %v532_v0, %v3553_v18  ;;  %v3599_v0 = vrot.slane %v797_v37, %v3295_v44  ;;  %v3622_v59 = vrot.slane %v615_v43, %v3553_v18 }
 0x165   : > { %v720_v45 = vpop.permute.xlu1 %719  ;;  %v706_v54 = vpop.permute.xlu0 %705 }
 0x166   : > { %v813_v39 = vcombine.low %v712_v28, %v720_v45  ;;  %v2617_v29 = vpack.i.bf16 %v3588_v3, %v3582_v52  ;;  %4888 = vst [vmem:[#allocation20_spill] sm:$0xff] %v3599_v0  ;;  %4892 = vst [vmem:[#allocation24_spill] sm:$0xff] %v3622_v59  ;;  %v814_v48 = vcombine.high %v712_v28, %v720_v45 }
 0x168   : > { %v3602_v47 = vrot.slane %v813_v39, %v3295_v44  ;;  %2618 = vrot.lane.b32.xlu0 %v2617_v29, %s3056_s30  ;;  %v3615_v29 = vrot.slane %v355_v50, %v3553_v18  ;;  %v798_v50 = vcombine.high %v708_v49, %v716_v35 }
 0x169   : > { %v710_v13 = vpop.permute.xlu1 %709  ;;  %v714_v60 = vpop.permute.xlu0 %713 }
 0x16a   : > { %4889 = vst [vmem:[#allocation21_spill] sm:$0xff] %v3602_v47  ;;  %v830_v14 = vcombine.high %v3599_v0, %v3602_v47  ;;  %v729_v37 = vcombine.low %v706_v54, %v714_v60  ;;  %v730_v53 = vcombine.high %v706_v54, %v714_v60  ;;  %4890 = vst [vmem:[#allocation22_spill] sm:$0xff] %v3615_v29 }
 0x16b   : > { %v514_v54 = vrot.slane %v500_v57, %v3295_v44 }
 0x16c   : > { %v3618_v39 = vrot.slane %v830_v14, %v3553_v18  ;;  %v4893_v14 = vcombine.low %v3399_v23, %v3372_v11  ;;  %v3634_v40 = vrot.slane %v729_v37, %v3295_v44  ;;  %v3637_v43 = vrot.slane %v730_v53, %v3295_v44 }
 0x16d   : > { %v718_v31 = vpop.permute.xlu1 %717  ;;  %v1390_v51 = vpop.permute.xlu0 %1389  ;;  %v547_v57 = vcombine.low %v514_v54, %v530_v20  ;;  %v548_v35 = vcombine.high %v514_v54, %v530_v20  ;;  %v828_v37 = vrot.slane %v814_v48, %v3295_v44  ;;  %v4895_v20 = vcombine.low %v3342_v1, %v3396_v22 }
 0x16e   : > { %4891 = vst [vmem:[#allocation23_spill] sm:$0xff] %v3618_v39  ;;  %v745_v61 = vcombine.low %v710_v13, %v718_v31  ;;  %v746_v24 = vcombine.high %v710_v13, %v718_v31  ;;  %v2622_v60 = vpack.i.bf16 %v3618_v39, %v3615_v29  ;;  %v3631_v16 = vrot.slane %v4893_v14, %v3553_v18 }
 0x170   : > { %4894 = vst [vmem:[#allocation25_spill] sm:$0xff] %v3631_v16  ;;  %v3640_v13 = vrot.slane %v745_v61, %v3295_v44  ;;  %v760_v28 = vrot.slane %v746_v24, %v3295_v44  ;;  %2623 = vrot.lane.b32.xlu1 %v2622_v60, %s3056_s30  ;;  %v2627_v31 = vpack.i.bf16 %v3631_v16, %v3622_v59 }
 0x171   : > { %v1394_v49 = vpop.permute.xlu1 %1393  ;;  %v1398_v45 = vpop.permute.xlu0 %1397  ;;  %v812_v24 = vrot.slane %v798_v50, %v3295_v44  ;;  %v3658_v60 = vrot.slane %v4895_v20, %v3553_v18  ;;  %v4898_v50 = vcombine.high %v3339_v63, %v3393_v21  ;;  %v3676_v20 = vrot.slane %v547_v57, %v3553_v18 }
 0x172   : > { %v762_v61 = vcombine.high %v3634_v40, %v3640_v13  ;;  %v777_v14 = vcombine.low %v3637_v43, %v760_v28  ;;  %v1479_v62 = vcombine.low %v1390_v51, %v1398_v45  ;;  %v1480_v47 = vcombine.high %v1390_v51, %v1398_v45 }
 0x173   : > { %4896 = vst [vmem:[#allocation26_spill] sm:$0xff] %v3658_v60  ;;  %v3670_v59 = vrot.slane %v4898_v50, %v3553_v18  ;;  %4901 = vst [vmem:[#allocation30_spill] sm:$0xff] %v3676_v20  ;;  %v846_v29 = vcombine.high %v812_v24, %v828_v37  ;;  %v845_v5 = vcombine.low %v812_v24, %v828_v37 }
 0x174   : > { %2628 = vrot.lane.b32.xlu1 %v2627_v31, %s3057_s5  ;;  %v3661_v48 = vrot.slane %v777_v14, %v3553_v18  ;;  %v3664_v54 = vrot.slane %v762_v61, %v3553_v18  ;;  %v3673_v31 = vrot.slane %v548_v35, %v3553_v18  ;;  %v4902_v35 = vcombine.high %v3428_v42, %v3413_v30 }
 0x175   : > { %v1402_v53 = vpop.permute.xlu1 %1401  ;;  %v1842_v16 = vpop.permute.xlu0 %1841  ;;  %4899 = vst [vmem:[#allocation28_spill] sm:$0xff] %v3670_v59  ;;  %v4904_v45 = vcombine.low %v3428_v42, %v3413_v30  ;;  %v616_v24 = vcombine.high %v3596_v34, %v3591_v32  ;;  %v3715_v42 = vrot.slane %v845_v5, %v3553_v18 }
 0x176   : > { %4897 = vst [vmem:[#allocation27_spill] sm:$0xff] %v3664_v54  ;;  %4900 = vst [vmem:[#allocation29_spill] sm:$0xff] %v3673_v31  ;;  %v1495_v14 = vcombine.low %v1394_v49, %v1402_v53  ;;  %v1496_v39 = vcombine.high %v1394_v49, %v1402_v53  ;;  %v2657_v61 = vpack.i.bf16 %v3661_v48, %v3658_v60 }
 0x177   : > { %v2632_v0 = vpack.i.bf16 %v3664_v54, %v3670_v59  ;;  %v3687_v57 = vrot.slane %v4902_v35, %v3553_v18  ;;  %v3698_v53 = vrot.slane %v4904_v45, %v3553_v18  ;;  %v1494_v35 = vrot.slane %v1480_v47, %v3295_v44 }
 0x178   : > { %2658 = vrot.lane.b32.xlu1 %v2657_v61, %s3057_s5  ;;  %v3690_v50 = vrot.slane %v1495_v14, %v3295_v44  ;;  %v1510_v49 = vrot.slane %v1496_v39, %v3295_v44  ;;  %v778_v61 = vcombine.high %v3637_v43, %v760_v28  ;;  %v3706_v39 = vrot.slane %v846_v29, %v3553_v18 }
 0x179   : > { %4903 = vst [vmem:[#allocation31_spill] sm:$0xff] %v3687_v57  ;;  %2633 = vrot.lane.b32.xlu0 %v2632_v0, %s3056_s30  ;;  %v1846_v37 = vpop.permute.xlu1 %1845  ;;  %v1850_v51 = vpop.permute.xlu0 %1849  ;;  %4905 = vst [vmem:[#allocation32_spill] sm:$0xff] %v3698_v53  ;;  %v2662_v14 = vpack.i.bf16 %v3687_v57, %v3673_v31  ;;  %v3709_v0 = vrot.slane %v1479_v62, %v3295_v44  ;;  %v2637_v30 = vpack.i.bf16 %v3698_v53, %v3676_v20 }
 0x17a   : > { %4906 = vst [vmem:[#allocation33_spill] sm:$0xff] %v3706_v39  ;;  %v1931_v32 = vcombine.low %v1842_v16, %v1850_v51  ;;  %v1932_v34 = vcombine.high %v1842_v16, %v1850_v51  ;;  %v4907_v29 = vcombine.high %v3446_v58, %v3404_v25  ;;  %v1527_v47 = vcombine.low %v1494_v35, %v1510_v49 }
 0x17b   : > { %v1512_v62 = vcombine.high %v3709_v0, %v3690_v50  ;;  %v4909_v16 = vcombine.low %v3446_v58, %v3404_v25  ;;  %v3736_v53 = vrot.slane %v778_v61, %v3553_v18  ;;  %v1528_v20 = vcombine.high %v1494_v35, %v1510_v49 }
 0x17c   : > { %2663 = vrot.lane.b32.xlu1 %v2662_v14, %s3058_s26  ;;  %v3722_v43 = vrot.slane %v4907_v29, %v3553_v18  ;;  %v4911_v59 = vcombine.high %v3342_v1, %v3396_v22  ;;  %v3747_v25 = vrot.slane %v616_v24, %v3553_v18  ;;  %v3750_v58 = vrot.slane %v1931_v32, %v3295_v44 }
 0x17d   : > { %2638 = vrot.lane.b32.xlu0 %v2637_v30, %s3057_s5  ;;  %v1854_v28 = vpop.permute.xlu1 %1853  ;;  %v1388_v5 = vpop.permute.xlu0 %1387  ;;  %v3731_v51 = vrot.slane %v4909_v16, %v3553_v18  ;;  %4910 = vst [vmem:[#allocation35_spill] sm:$0xff] %v3736_v53  ;;  %v1526_v35 = vrot.slane %v1512_v62, %v3553_v18  ;;  %v3767_v32 = vrot.slane %v1527_v47, %v3553_v18 }
 0x17e   : > { %4908 = vst [vmem:[#allocation34_spill] sm:$0xff] %v3722_v43  ;;  %v1947_v45 = vcombine.low %v1846_v37, %v1854_v28  ;;  %v1948_v14 = vcombine.high %v1846_v37, %v1854_v28  ;;  %v2672_v29 = vpack.i.bf16 %v3706_v39, %v3722_v43  ;;  %v3744_v54 = vrot.slane %v4911_v59, %v3553_v18 }
 0x17f   : > { %v2642_v30 = vpack.i.bf16 %v3715_v42, %v3731_v51  ;;  %v1946_v37 = vrot.slane %v1932_v34, %v3295_v44  ;;  %v4913_v59 = vcombine.high %v3399_v23, %v3372_v11  ;;  %v3776_v11 = vrot.slane %v1528_v20, %v3553_v18 }
 0x180   : > { %4912 = vst [vmem:[#allocation36_spill] sm:$0xff] %v3744_v54  ;;  %v3754_v61 = vrot.slane %v1947_v45, %v3295_v44  ;;  %v1962_v49 = vrot.slane %v1948_v14, %v3295_v44  ;;  %2673 = vrot.lane.b32.xlu1 %v2672_v29, %s3058_s26  ;;  %v2687_v45 = vpack.i.bf16 %v3736_v53, %v3744_v54 }
 0x181   : > { %2643 = vrot.lane.b32.xlu0 %v2642_v30, %s3057_s5  ;;  %v1392_v1 = vpop.permute.xlu1 %1391  ;;  %v1396_v22 = vpop.permute.xlu0 %1395  ;;  %v3763_v24 = vrot.slane %v4913_v59, %v3553_v18  ;;  %v1694_v57 = vcombine.high %v3299_v46, %v3288_v41 }
 0x182   : > { %v1964_v34 = vcombine.high %v3750_v58, %v3754_v61  ;;  %v1979_v28 = vcombine.low %v1946_v37, %v1962_v49  ;;  %v1980_v16 = vcombine.high %v1946_v37, %v1962_v49  ;;  %v1411_v23 = vcombine.low %v1388_v5, %v1396_v22 }
 0x183   : > { %v2647_v14 = vpack.i.bf16 %v3763_v24, %v3747_v25  ;;  %v4914_v49 = vmov 0.0   ;;  %v1412_v53 = vcombine.high %v1388_v5, %v1396_v22 }
 0x184   : > { %2688 = vrot.lane.b32.xlu1 %v2687_v45, %s3058_s26  ;;  %v1978_v62 = vrot.slane %v1964_v34, %v3553_v18  ;;  %v3781_v47 = vrot.slane %v1979_v28, %v3553_v18  ;;  %v3784_v29 = vrot.slane %v1980_v16, %v3553_v18  ;;  %v3788_v59 = vcombine.high %v1526_v35, %v4914_v49 }
 0x185   : > { %2648 = vrot.lane.b32.xlu0 %v2647_v14, %s3058_s26  ;;  %v1400_v30 = vpop.permute.xlu1 %1399  ;;  %v1840_v37 = vpop.permute.xlu0 %1839  ;;  %v3792_v20 = vcombine.high %v3767_v32, %v4914_v49  ;;  %v3803_v14 = vcombine.high %v3776_v11, %v4914_v49  ;;  %v3810_v39 = vrot.slane %v1411_v23, %v3295_v44 }
 0x186   : > { %4915 = vst [vmem:[#allocation37_spill] sm:$0xff] %v3788_v59  ;;  %v1427_v45 = vcombine.low %v1392_v1, %v1400_v30  ;;  %v1428_v54 = vcombine.high %v1392_v1, %v1400_v30  ;;  %v2652_v34 = vpack.i.bf16 %v1978_v62, %v1526_v35  ;;  %v3795_v28 = vcombine.high %v1978_v62, %v4914_v49 }
 0x187   : > { %4916 = vst [vmem:[#allocation38_spill] sm:$0xff] %v3792_v20  ;;  %v3799_v16 = vcombine.high %v3781_v47, %v4914_v49  ;;  %4919 = vst [vmem:[#allocation41_spill] sm:$0xff] %v3803_v14  ;;  %v3807_v43 = vcombine.high %v3784_v29, %v4914_v49 }
 0x188   : > { %4917 = vst [vmem:[#allocation39_spill] sm:$0xff] %v3795_v28  ;;  %4921 = vst [vmem:[#allocation43_spill] sm:$0xff] %v3810_v39  ;;  %v3813_v1 = vrot.slane %v1427_v45, %v3295_v44  ;;  %v1442_v22 = vrot.slane %v1428_v54, %v3295_v44  ;;  %v1426_v45 = vrot.slane %v1412_v53, %v3295_v44 }
 0x189   : > { %4918 = vst [vmem:[#allocation40_spill] sm:$0xff] %v3799_v16  ;;  %4920 = vst [vmem:[#allocation42_spill] sm:$0xff] %v3807_v43  ;;  %2653 = vrot.lane.b32.xlu0 %v2652_v34, %s3056_s30  ;;  %v1844_v35 = vpop.permute.xlu1 %1843  ;;  %v1848_v62 = vpop.permute.xlu0 %1847  ;;  %v1710_v54 = vcombine.high %v3321_v55, %v3323_v56 }
 0x18a   : > { %4922 = vst [vmem:[#allocation44_spill] sm:$0xff] %v3813_v1  ;;  %v1863_v31 = vcombine.low %v1840_v37, %v1848_v62  ;;  %v1864_v60 = vcombine.high %v1840_v37, %v1848_v62  ;;  %v1444_v34 = vcombine.high %v3810_v39, %v3813_v1  ;;  %v1459_v5 = vcombine.low %v1426_v45, %v1442_v22 }
 0x18b   : > { %v1460_v14 = vcombine.high %v1426_v45, %v1442_v22  ;;  %v3841_v56 = vrot.slane %v1710_v54, %v3295_v44 }
 0x18c   : > { %v3833_v23 = vrot.slane %v1863_v31, %v3295_v44  ;;  %v1878_v53 = vrot.slane %v1864_v60, %v3295_v44  ;;  %v3845_v41 = vrot.slane %v1459_v5, %v3553_v18 }
 0x18d   : > { %v1852_v59 = vpop.permute.xlu1 %1851  ;;  %v1160_v28 = vpop.permute.xlu0 %1159 }
 0x18e   : > { %v1879_v30 = vcombine.low %v1844_v35, %v1852_v59  ;;  %v1880_v20 = vcombine.high %v1844_v35, %v1852_v59  ;;  %4923 = vst [vmem:[#allocation45_spill] sm:$0xff] %v3833_v23  ;;  %v1458_v59 = vrot.slane %v1444_v34, %v3553_v18 }
 0x190   : > { %v3837_v37 = vrot.slane %v1879_v30, %v3295_v44  ;;  %v1894_v55 = vrot.slane %v1880_v20, %v3295_v44  ;;  %v3852_v20 = vrot.slane %v1694_v57, %v3295_v44  ;;  %v3855_v30 = vrot.slane %v1460_v14, %v3553_v18 }
 0x191   : > { %v1164_v62 = vpop.permute.xlu1 %1163  ;;  %v1168_v43 = vpop.permute.xlu0 %1167  ;;  %v1726_v57 = vcombine.high %v3358_v7, %v3361_v8  ;;  %v3871_v14 = vcombine.high %v3845_v41, %v4914_v49 }
 0x192   : > { %4924 = vst [vmem:[#allocation46_spill] sm:$0xff] %v3837_v37  ;;  %v1896_v60 = vcombine.high %v3833_v23, %v3837_v37  ;;  %v1911_v31 = vcombine.low %v1878_v53, %v1894_v55  ;;  %v1912_v22 = vcombine.high %v1878_v53, %v1894_v55  ;;  %v1249_v35 = vcombine.low %v1160_v28, %v1168_v43 }
 0x193   : > { %v1250_v45 = vcombine.high %v1160_v28, %v1168_v43  ;;  %v3865_v53 = vcombine.high %v1458_v59, %v4914_v49  ;;  %4926 = vst [vmem:[#allocation48_spill] sm:$0xff] %v3871_v14  ;;  %v1742_v43 = vcombine.high %v3852_v20, %v3841_v56  ;;  %v3887_v8 = vcombine.high %v3855_v30, %v4914_v49 }
 0x194   : > { %v1910_v54 = vrot.slane %v1896_v60, %v3553_v18  ;;  %v3859_v5 = vrot.slane %v1911_v31, %v3553_v18  ;;  %v3862_v34 = vrot.slane %v1912_v22, %v3553_v18  ;;  %v3879_v22 = vrot.slane %v1249_v35, %v3295_v44 }
 0x195   : > { %v1172_v46 = vpop.permute.xlu1 %1171  ;;  %v1158_v16 = vpop.permute.xlu0 %1157  ;;  %4925 = vst [vmem:[#allocation47_spill] sm:$0xff] %v3865_v53  ;;  %4930 = vst [vmem:[#allocation52_spill] sm:$0xff] %v3887_v8  ;;  %v1740_v23 = vrot.slane %v1726_v57, %v3553_v18  ;;  %v3921_v57 = vrot.slane %v1742_v43, %v3553_v18 }
 0x196   : > { %v1265_v28 = vcombine.low %v1164_v62, %v1172_v46  ;;  %v1266_v55 = vcombine.high %v1164_v62, %v1172_v46  ;;  %v2667_v60 = vpack.i.bf16 %v1910_v54, %v1458_v59  ;;  %v3876_v31 = vcombine.high %v1910_v54, %v4914_v49  ;;  %4928 = vst [vmem:[#allocation50_spill] sm:$0xff] %v3879_v22 }
 0x197   : > { %v3883_v1 = vcombine.high %v3859_v5, %v4914_v49  ;;  %v3891_v7 = vcombine.high %v3862_v34, %v4914_v49  ;;  %v3894_v62 = vrot.slane %v1250_v45, %v3295_v44  ;;  %v1642_v54 = vcombine.high %v3388_v19, %v3365_v10 }
 0x198   : > { %4927 = vst [vmem:[#allocation49_spill] sm:$0xff] %v3876_v31  ;;  %v3897_v59 = vrot.slane %v1265_v28, %v3295_v44  ;;  %v3900_v46 = vrot.slane %v1266_v55, %v3295_v44  ;;  %2668 = vrot.lane.b32.xlu0 %v2667_v60, %s3056_s30  ;;  %v1626_v10 = vcombine.high %v3380_v15, %v3349_v4 }
 0x199   : > { %4929 = vst [vmem:[#allocation51_spill] sm:$0xff] %v3883_v1  ;;  %4931 = vst [vmem:[#allocation53_spill] sm:$0xff] %v3891_v7  ;;  %v1162_v39 = vpop.permute.xlu1 %1161  ;;  %v1166_v37 = vpop.permute.xlu0 %1165  ;;  %v3928_v55 = vrot.slane %v1642_v54, %v3295_v44  ;;  %v3931_v7 = vcombine.high %v1740_v23, %v4914_v49  ;;  %v1658_v4 = vcombine.high %v3420_v36, %v3423_v38 }
 0x19a   : > { %4932 = vst [vmem:[#allocation54_spill] sm:$0xff] %v3897_v59  ;;  %v1282_v60 = vcombine.high %v3879_v22, %v3897_v59  ;;  %v1298_v35 = vcombine.high %v3894_v62, %v3900_v46  ;;  %v1181_v19 = vcombine.low %v1158_v16, %v1166_v37  ;;  %v1182_v45 = vcombine.high %v1158_v16, %v1166_v37 }
 0x19b   : > { %v3939_v37 = vrot.slane %v1626_v10, %v3295_v44  ;;  %v3946_v54 = vcombine.high %v3921_v57, %v4914_v49  ;;  %v1672_v1 = vrot.slane %v1658_v4, %v3553_v18 }
 0x19c   : > { %v1296_v53 = vrot.slane %v1282_v60, %v3553_v18  ;;  %v3925_v28 = vrot.slane %v1298_v35, %v3553_v18  ;;  %v3942_v35 = vrot.slane %v1181_v19, %v3295_v44 }
 0x19d   : > { %v1170_v31 = vpop.permute.xlu1 %1169  ;;  %v2072_v8 = vpop.permute.xlu0 %2071  ;;  %4934 = vst [vmem:[#allocation56_spill] sm:$0xff] %v3946_v54  ;;  %v1673_v38 = vcombine.low %v3939_v37, %v3928_v55 }
 0x19e   : > { %v1197_v15 = vcombine.low %v1162_v39, %v1170_v31  ;;  %v1198_v43 = vcombine.high %v1162_v39, %v1170_v31  ;;  %v2677_v14 = vpack.i.bf16 %v1740_v23, %v1296_v53  ;;  %v3936_v16 = vcombine.high %v1296_v53, %v4914_v49  ;;  %4933 = vst [vmem:[#allocation55_spill] sm:$0xff] %v3942_v35 }
 0x19f   : > { %v3950_v60 = vcombine.high %v3925_v28, %v4914_v49  ;;  %v3953_v39 = vrot.slane %v1182_v45, %v3295_v44  ;;  %v2682_v31 = vpack.i.bf16 %v3781_v47, %v3767_v32  ;;  %v3988_v54 = vrot.slane %v1673_v38, %v3553_v18 }
 0x1a0   : > { %v3956_v23 = vrot.slane %v1197_v15, %v3295_v44  ;;  %v3959_v53 = vrot.slane %v1198_v43, %v3295_v44  ;;  %2678 = vrot.lane.b32.xlu0 %v2677_v14, %s3056_s30  ;;  %v3985_v15 = vcombine.high %v1672_v1, %v4914_v49  ;;  %v1297_v32 = vcombine.low %v3894_v62, %v3900_v46 }
 0x1a1   : > { %4935 = vst [vmem:[#allocation57_spill] sm:$0xff] %v3950_v60  ;;  %v2076_v10 = vpop.permute.xlu1 %2075  ;;  %v2080_v19 = vpop.permute.xlu0 %2079  ;;  %v1741_v38 = vcombine.low %v3852_v20, %v3841_v56 }
 0x1a2   : > { %4936 = vst [vmem:[#allocation58_spill] sm:$0xff] %v3956_v23  ;;  %v1214_v43 = vcombine.high %v3942_v35, %v3956_v23  ;;  %v1229_v14 = vcombine.low %v3953_v39, %v3959_v53  ;;  %v2161_v36 = vcombine.low %v2072_v8, %v2080_v19  ;;  %v2162_v62 = vcombine.high %v2072_v8, %v2080_v19 }
 0x1a3   : > { %v2717_v8 = vpack.i.bf16 %v3862_v34, %v3855_v30  ;;  %v4024_v19 = vrot.slane %v1741_v38, %v3553_v18  ;;  %v1230_v38 = vcombine.high %v3953_v39, %v3959_v53  ;;  %v1674_v39 = vcombine.high %v3939_v37, %v3928_v55 }
 0x1a4   : > { %2683 = vrot.lane.b32.xlu0 %v2682_v31, %s3057_s5  ;;  %v1228_v4 = vrot.slane %v1214_v43, %v3553_v18  ;;  %v3980_v59 = vrot.slane %v1229_v14, %v3553_v18  ;;  %v3998_v35 = vrot.slane %v2161_v36, %v3295_v44  ;;  %v4939_v37 = vcombine.low %v3634_v40, %v3640_v13 }
 0x1a5   : > { %v2084_v45 = vpop.permute.xlu1 %2083  ;;  %v3982_v60 = vpop.permute.xlu0 %2069 }
 0x1a6   : > { %v2177_v47 = vcombine.low %v2076_v10, %v2084_v45  ;;  %v2692_v23 = vpack.i.bf16 %v1672_v1, %v1228_v4  ;;  %v3993_v31 = vcombine.high %v1228_v4, %v4914_v49  ;;  %v2178_v43 = vcombine.high %v2076_v10, %v2084_v45 }
 0x1a7   : > { %v2712_v14 = vpack.i.bf16 %v3988_v54, %v3980_v59  ;;  %v2697_v45 = vpack.i.bf16 %v3859_v5, %v3845_v41  ;;  %v4014_v4 = vrot.slane %v1297_v32, %v3553_v18  ;;  %v2176_v41 = vrot.slane %v2162_v62, %v3295_v44 }
 0x1a8   : > { %v4001_v22 = vrot.slane %v2177_v47, %v3295_v44  ;;  %2693 = vrot.lane.b32.xlu1 %v2692_v23, %s3056_s30  ;;  %v2852_v1 = vpack.i.bf16 %v3985_v15, %v3993_v31  ;;  %v2192_v23 = vrot.slane %v2178_v43, %v3295_v44  ;;  %v1691_v31 = vcombine.high %v3988_v54, %v4914_v49 }
 0x1a9   : > { %2713 = vrot.lane.b32.xlu0 %v2712_v14, %s3057_s5  ;;  %v2074_v46 = vpop.permute.xlu1 %2073  ;;  %v2078_v10 = vpop.permute.xlu0 %2077  ;;  %v2702_v47 = vpack.i.bf16 %v4024_v19, %v4014_v4 }
 0x1aa   : > { %v2193_v36 = vcombine.low %v3998_v35, %v4001_v22  ;;  %v2194_v56 = vcombine.high %v3998_v35, %v4001_v22  ;;  %v2093_v20 = vcombine.low %v3982_v60, %v2078_v10  ;;  %v2209_v43 = vcombine.low %v2176_v41, %v2192_v23 }
 0x1ab   : > { %v1315_v22 = vcombine.high %v4014_v4, %v4914_v49 }
 0x1ac   : > { %2698 = vrot.lane.b32.xlu1 %v2697_v45, %s3057_s5  ;;  %v4031_v14 = vrot.slane %v2194_v56, %v3553_v18  ;;  %v4034_v30 = vrot.slane %v2093_v20, %v3295_v44  ;;  %v2707_v45 = vpack.i.bf16 %v3784_v29, %v3776_v11  ;;  %v2210_v56 = vcombine.high %v2176_v41, %v2192_v23 }
 0x1ad   : > { %2718 = vrot.lane.b32.xlu0 %v2717_v8, %s3058_s26  ;;  %v2082_v5 = vpop.permute.xlu1 %2081  ;;  %v4049_v8 = vrot.slane %v2209_v43, %v3553_v18  ;;  %v4937_v20 = vcombine.low %v3547_v9, %v3550_v12  ;;  %v4938_v11 = vcombine.low %v3345_v2, %v3355_v6  ;;  %v2722_v9 = vpack.i.bf16 %v3921_v57, %v3925_v28 }
 0x1ae   : > { %v2109_v32 = vcombine.low %v2074_v46, %v2082_v5  ;;  %v2110_v53 = vcombine.high %v2074_v46, %v2082_v5  ;;  %v4071_v12 = vrot.slane %v1230_v38, %v3553_v18  ;;  %v4074_v23 = vrot.slane %v2210_v56, %v3553_v18 }
 0x1af   : > { %v4066_v29 = vrot.slane %v4938_v11, %v3553_v18  ;;  %v4082_v2 = vrot.slane %v4939_v37, %v3553_v18  ;;  %v2094_v6 = vcombine.high %v3982_v60, %v2078_v10  ;;  %v4087_v28 = vrot.slane %v1674_v39, %v3553_v18  ;;  %v4943_v37 = vld [vmem:[#allocation20_spill] sm:$0xff] }
 0x1b0   : > { %v4037_v34 = vrot.slane %v2109_v32, %v3295_v44  ;;  %2703 = vrot.lane.b32.xlu1 %v2702_v47, %s3057_s5  ;;  %v4055_v32 = vrot.slane %v4937_v20, %v3553_v18  ;;  %v4940_v46 = vcombine.low %v3339_v63, %v3393_v21  ;;  %v2124_v13 = vrot.slane %v2110_v53, %v3295_v44 }
 0x1b1   : > { %2262 = vrot.lane.b32.xlu0 %v4031_v14, %s3056_s30  ;;  %v1075_v57 = vcombine.high %v4066_v29, %v4914_v49  ;;  %v2727_v10 = vpack.i.bf16 %v4087_v28, %v4071_v12  ;;  %v1963_v41 = vcombine.low %v3750_v58, %v3754_v61  ;;  %v793_v47 = vcombine.high %v4082_v2, %v4914_v49 }
 0x1b2   : > { %v2125_v62 = vcombine.low %v4034_v30, %v4037_v34  ;;  %v631_v55 = vcombine.high %v4055_v32, %v4914_v49  ;;  %v4097_v40 = vrot.slane %v4940_v46, %v3553_v18  ;;  %v2126_v60 = vcombine.high %v4034_v30, %v4037_v34 }
 0x1b3   : > { %v2108_v43 = vrot.slane %v2094_v6, %v3295_v44  ;;  %v1511_v63 = vcombine.low %v3709_v0, %v3690_v50  ;;  %v4119_v61 = vrot.slane %v1963_v41, %v3553_v18  ;;  %v564_v44 = vcombine.high %v3582_v52, %v4914_v49  ;;  %v4944_v6 = vld [vmem:[#allocation21_spill] sm:$0xff] }
 0x1b4   : > { %2708 = vrot.lane.b32.xlu1 %v2707_v45, %s3058_s26  ;;  %v2732_v5 = vpack.i.bf16 %v1075_v57, %v631_v55  ;;  %v318_v21 = vcombine.high %v4097_v40, %v4914_v49  ;;  %v4116_v58 = vrot.slane %v2126_v60, %v3553_v18  ;;  %v1008_v50 = vcombine.high %v3588_v3, %v4914_v49  ;;  %v4946_v60 = vld [vmem:[#allocation12_spill] sm:$0xff] }
 0x1b5   : > { %2270 = vrot.lane.b32.xlu0 %v4049_v8, %s3057_s5  ;;  %v2141_v38 = vcombine.low %v2108_v43, %v2124_v13  ;;  %v4129_v0 = vrot.slane %v1511_v63, %v3553_v18  ;;  %v2142_v56 = vcombine.high %v2108_v43, %v2124_v13  ;;  %v4941_v39 = vcombine.low %v3571_v17, %v3574_v33 }
 0x1b6   : > { %v2752_v45 = vpack.i.bf16 %v793_v47, %v318_v21  ;;  %v2757_v11 = vpack.i.bf16 %v1008_v50, %v564_v44  ;;  %v1995_v53 = vcombine.high %v4119_v61, %v4914_v49  ;;  %v4942_v3 = vcombine.low %v3407_v26, %v3410_v27  ;;  %v4949_v44 = vld [vmem:[#allocation18_spill] sm:$0xff] }
 0x1b7   : > { %v4132_v20 = vrot.slane %v2141_v38, %v3553_v18  ;;  %v4138_v52 = vrot.slane %v4941_v39, %v3553_v18  ;;  %v1543_v33 = vcombine.high %v4129_v0, %v4914_v49  ;;  %v4154_v17 = vrot.slane %v2142_v56, %v3553_v18 }
 0x1b8   : > { %2723 = vrot.lane.b32.xlu1 %v2722_v9, %s3058_s26  ;;  %v4148_v9 = vrot.slane %v4942_v3, %v3553_v18  ;;  %v4945_v57 = vcombine.low %v4943_v37, %v4944_v6  ;;  %v863_v27 = vcombine.high %v3715_v42, %v4914_v49  ;;  %v388_v47 = vcombine.high %v3731_v51, %v4914_v49  ;;  %v4953_v37 = vld [vmem:[#allocation29_spill] sm:$0xff] }
 0x1b9   : > { %2278 = vrot.lane.b32.xlu0 %v4074_v23, %s3058_s26  ;;  %v563_v55 = vcombine.high %v4138_v52, %v4914_v49  ;;  %v2772_v26 = vpack.i.bf16 %v1995_v53, %v1543_v33  ;;  %v634_v21 = vcombine.high %v3747_v25, %v4914_v49  ;;  %v632_v50 = vcombine.high %v4949_v44, %v4914_v49  ;;  %v4950_v25 = vld [vmem:[#allocation19_spill] sm:$0xff]  ;;  %v4951_v53 = vld [vmem:[#allocation26_spill] sm:$0xff] }
 0x1ba   : > { %v4162_v46 = vrot.slane %v4945_v57, %v3553_v18  ;;  %v1007_v13 = vcombine.high %v4148_v9, %v4914_v49  ;;  %v2792_v63 = vpack.i.bf16 %v863_v27, %v388_v47  ;;  %v795_v56 = vcombine.high %v3661_v48, %v4914_v49  ;;  %v4952_v33 = vld [vmem:[#allocation23_spill] sm:$0xff]  ;;  %v4954_v57 = vld [vmem:[#allocation22_spill] sm:$0xff]  ;;  %v4957_v47 = vld [vmem:[#allocation33_spill] sm:$0xff] }
 0x1bb   : > { %v320_v3 = vcombine.high %v4951_v53, %v4914_v49  ;;  %v566_v6 = vcombine.high %v4953_v37, %v4914_v49  ;;  %v4955_v27 = vld [vmem:[#allocation31_spill] sm:$0xff]  ;;  %v1248_v4 = vcombine.high %v4071_v12, %v4914_v49  ;;  %v4374_v12 = vrot.slane %v2125_v62, %v3553_v18 }
 0x1bc   : > { %2728 = vrot.lane.b32.xlu1 %v2727_v10, %s3058_s26  ;;  %v4947_v10 = vld [vmem:[#allocation13_spill] sm:$0xff]  ;;  %v2737_v43 = vpack.i.bf16 %v1007_v13, %v563_v55  ;;  %v861_v42 = vcombine.high %v4162_v46, %v4914_v49  ;;  %v862_v55 = vcombine.high %v4952_v33, %v4914_v49  ;;  %v1010_v13 = vcombine.high %v4955_v27, %v4914_v49  ;;  %v4960_v44 = vld [vmem:[#allocation27_spill] sm:$0xff] }
 0x1bd   : > { %2733 = vrot.lane.b32.xlu0 %v2732_v5, %s3059_s7  ;;  %v4948_v41 = vcombine.low %v4946_v60, %v4947_v10  ;;  %v2812_v48 = vpack.i.bf16 %v795_v56, %v320_v3  ;;  %v4956_v10 = vld [vmem:[#allocation24_spill] sm:$0xff]  ;;  %v4963_v3 = vld [vmem:[#allocation45_spill] sm:$0xff]  ;;  %5006 = vst [vmem:[#allocation20_spill] sm:$0xff] %v4374_v12  ;;  %v2159_v62 = vcombine.high %v4132_v20, %v4914_v49 }
 0x1bf   : > { %v4174_v5 = vrot.slane %v4948_v41, %v3553_v18  ;;  %v633_v41 = vcombine.high %v4956_v10, %v4914_v49  ;;  %v4971_v10 = vld [vmem:[#allocation50_spill] sm:$0xff] }
 0x1c0   : > { %2234 = vrot.lane.b32.xlu1 %v4116_v58, %s3056_s30 }
 0x1c1   : > { %2753 = vrot.lane.b32.xlu0 %v2752_v45, %s3059_s7  ;;  %v386_v38 = vcombine.high %v4174_v5, %v4914_v49  ;;  %v1078_v45 = vcombine.high %v3763_v24, %v4914_v49 }
 0x1c3   : > { %v2742_v51 = vpack.i.bf16 %v861_v42, %v386_v38  ;;  %v2797_v39 = vpack.i.bf16 %v1078_v45, %v634_v21  ;;  %v2817_v42 = vpack.i.bf16 %v1010_v13, %v566_v6  ;;  %v4959_v38 = vld [vmem:[#allocation34_spill] sm:$0xff]  ;;  %v4966_v6 = vld [vmem:[#allocation32_spill] sm:$0xff] }
 0x1c4   : > { %2242 = vrot.lane.b32.xlu1 %v4132_v20, %s3057_s5  ;;  %v389_v45 = vcombine.high %v4959_v38, %v4914_v49  ;;  %v4974_v38 = vld [vmem:[#allocation14_spill] sm:$0xff] }
 0x1c5   : > { %2758 = vrot.lane.b32.xlu0 %v2757_v11, %s3060_s8  ;;  %v1076_v11 = vcombine.high %v4950_v25, %v4914_v49 }
 0x1c7   : > { %v2747_v24 = vpack.i.bf16 %v1076_v11, %v632_v50  ;;  %v794_v50 = vcombine.high %v4960_v44, %v4914_v49  ;;  %v4962_v11 = vld [vmem:[#allocation30_spill] sm:$0xff] }
 0x1c8   : > { %2250 = vrot.lane.b32.xlu1 %v4154_v17, %s3058_s26  ;;  %v565_v53 = vcombine.high %v4962_v11, %v4914_v49  ;;  %v4978_v44 = vld [vmem:[#allocation38_spill] sm:$0xff]  ;;  %v4980_v11 = vld [vmem:[#allocation55_spill] sm:$0xff] }
 0x1c9   : > { %2773 = vrot.lane.b32.xlu0 %v2772_v26, %s3059_s7  ;;  %v387_v26 = vcombine.high %v4954_v57, %v4914_v49  ;;  %v4967_v57 = vld [vmem:[#allocation43_spill] sm:$0xff] }
 0x1cb   : > { %v2762_v60 = vpack.i.bf16 %v862_v55, %v387_v26  ;;  %v4968_v26 = vld [vmem:[#allocation44_spill] sm:$0xff] }
 0x1cc   : > { %2738 = vrot.lane.b32.xlu1 %v2737_v43, %s3059_s7  ;;  %v864_v43 = vcombine.high %v4957_v47, %v4914_v49  ;;  %v4969_v27 = vcombine.low %v4967_v57, %v4968_v26  ;;  %v4984_v57 = vld [vmem:[#allocation17_spill] sm:$0xff] }
 0x1cd   : > { %2793 = vrot.lane.b32.xlu0 %v2792_v63, %s3061_s14  ;;  %v4958_v63 = vld [vmem:[#allocation25_spill] sm:$0xff] }
 0x1ce   : > { %v1077_v21 = vcombine.high %v4958_v63, %v4914_v49  ;;  %v2832_v56 = vpack.i.bf16 %v864_v43, %v389_v45  ;;  %v4239_v13 = vrot.slane %v4969_v27, %v3553_v18  ;;  %v4975_v45 = vld [vmem:[#allocation15_spill] sm:$0xff]  ;;  %v4987_v27 = vld [vmem:[#allocation48_spill] sm:$0xff] }
 0x1d0   : > { %2743 = vrot.lane.b32.xlu1 %v2742_v51, %s3059_s7  ;;  %v2767_v51 = vpack.i.bf16 %v1077_v21, %v633_v41  ;;  %v4972_v41 = vld [vmem:[#allocation54_spill] sm:$0xff]  ;;  %v1475_v21 = vcombine.high %v4239_v13, %v4914_v49 }
 0x1d1   : > { %2798 = vrot.lane.b32.xlu0 %v2797_v39, %s3062_s27  ;;  %v4961_v39 = vld [vmem:[#allocation28_spill] sm:$0xff]  ;;  %v4973_v47 = vcombine.low %v4971_v10, %v4972_v41 }
 0x1d2   : > { %v319_v25 = vcombine.high %v4961_v39, %v4914_v49 }
 0x1d3   : > { %v4250_v43 = vrot.slane %v4973_v47, %v3553_v18  ;;  %v4989_v47 = vld [vmem:[#allocation39_spill] sm:$0xff] }
 0x1d4   : > { %2748 = vrot.lane.b32.xlu1 %v2747_v24, %s3060_s8  ;;  %v4964_v24 = vld [vmem:[#allocation46_spill] sm:$0xff]  ;;  %v2777_v37 = vpack.i.bf16 %v794_v50, %v319_v25 }
 0x1d5   : > { %2813 = vrot.lane.b32.xlu0 %v2812_v48, %s3061_s14  ;;  %v4965_v33 = vcombine.low %v4963_v3, %v4964_v24  ;;  %v1009_v48 = vcombine.high %v4966_v6, %v4914_v49  ;;  %v1313_v39 = vcombine.high %v4250_v43, %v4914_v49  ;;  %v1247_v6 = vcombine.high %v3980_v59, %v4914_v49 }
 0x1d7   : > { %v4231_v55 = vrot.slane %v4965_v33, %v3553_v18  ;;  %v4282_v33 = vpop.permute.xlu0 %2613  ;;  %v2872_v41 = vpack.i.bf16 %v1691_v31, %v1247_v6  ;;  %v1759_v31 = vcombine.high %v4024_v19, %v4914_v49  ;;  %v2227_v19 = vcombine.high %v4049_v8, %v4914_v49 }
 0x1d8   : > { %2763 = vrot.lane.b32.xlu1 %v2762_v60, %s3060_s8  ;;  %v4970_v60 = vpack.i.bf16 %v3931_v7, %v3936_v16  ;;  %v4976_v7 = vcombine.low %v4974_v38, %v4975_v45  ;;  %v4992_v45 = vld [vmem:[#allocation53_spill] sm:$0xff] }
 0x1d9   : > { %2818 = vrot.lane.b32.xlu0 %v2817_v42, %s3062_s27  ;;  %v2782_v42 = vpack.i.bf16 %v1009_v48, %v565_v53  ;;  %v1927_v63 = vcombine.high %v4231_v55, %v4914_v49  ;;  %v4981_v53 = vld [vmem:[#allocation58_spill] sm:$0xff]  ;;  %v4983_v48 = vld [vmem:[#allocation16_spill] sm:$0xff] }
 0x1da   : > { %v4261_v16 = vrot.slane %v4976_v7, %v3553_v18  ;;  %v4982_v3 = vcombine.low %v4980_v11, %v4981_v53  ;;  %v4985_v26 = vcombine.low %v4983_v48, %v4984_v57  ;;  %v4993_v7 = vld [vmem:[#allocation52_spill] sm:$0xff]  ;;  %v5001_v57 = vld [vmem:[#allocation57_spill] sm:$0xff] }
 0x1db   : > { %v4299_v10 = vpop.permute.xlu0 %2618  ;;  %v5000_v48 = vld [vmem:[#allocation56_spill] sm:$0xff] }
 0x1dc   : > { %2768 = vrot.lane.b32.xlu1 %v2767_v51, %s3061_s14  ;;  %v4977_v51 = vld [vmem:[#allocation40_spill] sm:$0xff]  ;;  %v1757_v25 = vcombine.high %v4261_v16, %v4914_v49  ;;  %v4280_v24 = vrot.slane %v4982_v3, %v3553_v18  ;;  %v4291_v15 = vrot.slane %v4985_v26, %v3553_v18  ;;  %v4997_v3 = vld [vmem:[#allocation49_spill] sm:$0xff]  ;;  %v5002_v26 = vpack.i.bf16 %v5000_v48, %v5001_v57 }
 0x1dd   : > { %2833 = vrot.lane.b32.xlu0 %v2832_v56, %s3062_s27  ;;  %v4979_v50 = vpack.i.bf16 %v4977_v51, %v4978_v44  ;;  %v2787_v56 = vpack.i.bf16 %v1927_v63, %v1475_v21  ;;  %v4994_v51 = vpack.i.bf16 %v4992_v45, %v4993_v7  ;;  %v4995_v44 = vld [vmem:[#allocation35_spill] sm:$0xff]  ;;  %v2157_v7 = vcombine.high %v4374_v12, %v4914_v49 }
 0x1de   : > { %v1245_v59 = vcombine.high %v4280_v24, %v4914_v49  ;;  %v1689_v21 = vcombine.high %v4291_v15, %v4914_v49 }
 0x1e0   : > { %2778 = vrot.lane.b32.xlu1 %v2777_v37, %s3060_s8  ;;  %v2802_v37 = vpack.i.bf16 %v1757_v25, %v1313_v39  ;;  %v2822_v38 = vpack.i.bf16 %v1689_v21, %v1245_v59  ;;  %v4996_v39 = vld [vmem:[#allocation36_spill] sm:$0xff]  ;;  %v2226_v59 = vcombine.high %v4031_v14, %v4914_v49  ;;  %v5004_v14 = vld [vmem:[#allocation41_spill] sm:$0xff] }
 0x1e1   : > { %2838 = vrot.lane.b32.xlu0 %v4970_v60, %s3060_s8  ;;  %v321_v25 = vcombine.high %v4996_v39, %v4914_v49 }
 0x1e2   : > { %v4327_v11 = vpop.permute.xlu1 %2623 }
 0x1e4   : > { %2783 = vrot.lane.b32.xlu1 %v2782_v42, %s3061_s14  ;;  %v4990_v42 = vld [vmem:[#allocation37_spill] sm:$0xff] }
 0x1e5   : > { %2843 = vrot.lane.b32.xlu0 %v4979_v50, %s3061_s14  ;;  %v4991_v63 = vpack.i.bf16 %v4989_v47, %v4990_v42  ;;  %v796_v50 = vcombine.high %v4995_v44, %v4914_v49 }
 0x1e7   : > { %v2847_v35 = vpack.i.bf16 %v796_v50, %v321_v25 }
 0x1e8   : > { %2788 = vrot.lane.b32.xlu1 %v2787_v56, %s3059_s7  ;;  %v4323_v56 = vrot.slane %v2193_v36, %v3553_v18  ;;  %v2158_v18 = vcombine.high %v4116_v58, %v4914_v49 }
 0x1e9   : > { %2853 = vrot.lane.b32.xlu0 %v2852_v1, %s3060_s8  ;;  %v4986_v1 = vld [vmem:[#allocation51_spill] sm:$0xff] }
 0x1ea   : > { %v4988_v60 = vpack.i.bf16 %v4986_v1, %v4987_v27  ;;  %v2225_v36 = vcombine.high %v4323_v56, %v4914_v49  ;;  %v4347_v1 = vpop.permute.xlu1 %2628 }
 0x1eb   : > { %v4310_v54 = vpop.permute.xlu0 %2633 }
 0x1ec   : > { %2803 = vrot.lane.b32.xlu1 %v2802_v37, %s3059_s7  ;;  %v4998_v37 = vld [vmem:[#allocation47_spill] sm:$0xff] }
 0x1ed   : > { %2858 = vrot.lane.b32.xlu0 %v4988_v60, %s3061_s14  ;;  %v4999_v6 = vpack.i.bf16 %v4997_v3, %v4998_v37  ;;  %v2862_v60 = vpack.i.bf16 %v1759_v31, %v1315_v22 }
 0x1ee   : > { %v4361_v47 = vpop.permute.xlu1 %2658 }
 0x1ef   : > { %v4329_v53 = vpop.permute.xlu0 %2638 }
 0x1f0   : > { %2808 = vrot.lane.b32.xlu1 %v4991_v63, %s3060_s8  ;;  %v5003_v63 = vld [vmem:[#allocation42_spill] sm:$0xff] }
 0x1f1   : > { %2873 = vrot.lane.b32.xlu0 %v2872_v41, %s3061_s14  ;;  %v1692_v41 = vcombine.high %v4087_v28, %v4914_v49  ;;  %v5005_v21 = vpack.i.bf16 %v5003_v63, %v5004_v14  ;;  %v2228_v28 = vcombine.high %v4074_v23, %v4914_v49  ;;  %v2620_v63 = vunpack.i.l.bf16 %v4299_v10 }
 0x1f3   : > { %v4349_v27 = vpop.permute.xlu0 %2643  ;;  %v2887_v8 = vpack.i.bf16 %v1692_v41, %v1248_v4  ;;  %v2616_v4 = vunpack.i.h.bf16 %v4282_v33  ;;  %v2621_v41 = vunpack.i.h.bf16 %v4299_v10 }
 0x1f4   : > { %2823 = vrot.lane.b32.xlu1 %v2822_v38, %s3059_s7  ;;  %v4380_v38 = vpop.permute.xlu1 %2663 }
 0x1f5   : > { %2878 = vrot.lane.b32.xlu0 %v4994_v51, %s3062_s27  ;;  %v2160_v51 = vcombine.high %v4154_v17, %v4914_v49 }
 0x1f7   : > { %v4363_v42 = vpop.permute.xlu0 %2648 }
 0x1f8   : > { %2828 = vrot.lane.b32.xlu1 %v4999_v6, %s3060_s8  ;;  %v4391_v34 = vpop.permute.xlu1 %2673 }
 0x1f9   : > { %2883 = vrot.lane.b32.xlu0 %v5002_v26, %s3062_s27 }
 0x1fb   : > { %v4382_v45 = vpop.permute.xlu0 %2653 }
 0x1fc   : > { %2848 = vrot.lane.b32.xlu1 %v2847_v35, %s3062_s27  ;;  %v4401_v44 = vpop.permute.xlu1 %2688 }
 0x1fd   : > { %2258 = vrot.lane.b32.xlu0 %v2225_v36, %s3059_s7 }
 0x200   : > { %2863 = vrot.lane.b32.xlu1 %v2862_v60, %s3061_s14 }
 0x201   : > { %2266 = vrot.lane.b32.xlu0 %v2226_v59, %s3060_s8 }
 0x204   : > { %2868 = vrot.lane.b32.xlu1 %v5005_v21, %s3062_s27 }
 0x205   : > { %2274 = vrot.lane.b32.xlu0 %v2227_v19, %s3061_s14  ;;  %v2615_v19 = vunpack.i.l.bf16 %v4282_v33 }
 0x208   : > { %2888 = vrot.lane.b32.xlu1 %v2887_v8, %s3062_s27  ;;  %v2641_v8 = vunpack.i.h.bf16 %v4329_v53 }
 0x209   : > { %2282 = vrot.lane.b32.xlu0 %v2228_v28, %s3062_s27  ;;  %v2631_v28 = vunpack.i.h.bf16 %v4347_v1 }
 0x20a   : > { %v4389_v30 = vpop.permute.xlu0 %2668 }
 0x20c   : > { %2230 = vrot.lane.b32.xlu1 %v2157_v7, %s3059_s7 }
 0x210   : > { %2238 = vrot.lane.b32.xlu1 %v2158_v18, %s3060_s8 }
 0x212   : > { %v4396_v23 = vpop.permute.xlu0 %2678 }
 0x214   : > { %2246 = vrot.lane.b32.xlu1 %v2159_v62, %s3061_s14 }
 0x216   : > { %v4403_v50 = vpop.permute.xlu0 %2683 }
 0x218   : > { %2254 = vrot.lane.b32.xlu1 %v2160_v51, %s3062_s27  ;;  %v2630_v51 = vunpack.i.l.bf16 %v4347_v1 }
 0x21a   : > { %v4406_v58 = vpop.permute.xlu1 %2693 }
 0x21b   : > { %v4408_v39 = vpop.permute.xlu0 %2713 }
 0x21e   : > { %v4410_v25 = vpop.permute.xlu1 %2698 }
 0x21f   : > { %v4412_v20 = vpop.permute.xlu0 %2718 }
 0x222   : > { %v4414_v3 = vpop.permute.xlu1 %2703 }
 0x223   : > { %v4416_v37 = vpop.permute.xlu0 %2262 }
 0x224   : > { %5007 = vst [vmem:[#allocation21_spill] sm:$0xff] %v4416_v37 }
 0x226   : > { %v4418_v6 = vpop.permute.xlu1 %2708 }
 0x227   : > { %v4420_v49 = vpop.permute.xlu0 %2270 }
 0x228   : > { %5008 = vst [vmem:[#allocation12_spill] sm:$0xff] %v4420_v49 }
 0x22a   : > { %v4422_v17 = vpop.permute.xlu1 %2723 }
 0x22b   : > { %v4424_v48 = vpop.permute.xlu0 %2278 }
 0x22c   : > { %5009 = vst [vmem:[#allocation13_spill] sm:$0xff] %v4424_v48 }
 0x22e   : > { %v4426_v57 = vpop.permute.xlu1 %2728 }
 0x22f   : > { %v2734_v26 = vpop.permute.xlu0 %2733 }
 0x230   : > { %v2736_v33 = vunpack.i.h.bf16 %v2734_v26 }
 0x232   : > { %v4428_v22 = vpop.permute.xlu1 %2234 }
 0x233   : > { %5010 = vst [vmem:[#allocation18_spill] sm:$0xff] %v4428_v22  ;;  %v4430_v35 = vpop.permute.xlu0 %2753 }
 0x236   : > { %v4432_v36 = vpop.permute.xlu1 %2242 }
 0x237   : > { %5011 = vst [vmem:[#allocation19_spill] sm:$0xff] %v4432_v36  ;;  %v2759_v31 = vpop.permute.xlu0 %2758  ;;  %v2735_v36 = vunpack.i.l.bf16 %v2734_v26  ;;  %v2651_v26 = vunpack.i.h.bf16 %v4363_v42 }
 0x238   : > { %v2761_v22 = vunpack.i.h.bf16 %v2759_v31  ;;  %v2760_v48 = vunpack.i.l.bf16 %v2759_v31 }
 0x23a   : > { %v4434_v60 = vpop.permute.xlu1 %2250 }
 0x23b   : > { %5012 = vst [vmem:[#allocation26_spill] sm:$0xff] %v4434_v60  ;;  %v4436_v59 = vpop.permute.xlu0 %2773  ;;  %v2690_v60 = vunpack.i.l.bf16 %v4401_v44 }
 0x23e   : > { %v2739_v21 = vpop.permute.xlu1 %2738 }
 0x23f   : > { %v2741_v7 = vunpack.i.h.bf16 %v2739_v21  ;;  %v2740_v18 = vunpack.i.l.bf16 %v2739_v21  ;;  %v4445_v62 = vpop.permute.xlu0 %2793  ;;  %v2640_v21 = vunpack.i.l.bf16 %v4329_v53 }
 0x241   : > { %v1135_v10 = vsel %vm446_vm3, %v4148_v9, %v2741_v7  ;;  %v691_v14 = vsel %vm446_vm3, %v4138_v52, %v2740_v18  ;;  %v2635_v52 = vunpack.i.l.bf16 %v4310_v54 }
 0x242   : > { %v1136_v12 = vsel %vm448_vm4, %v1135_v10, %v2621_v41  ;;  %v692_v1 = vsel %vm448_vm4, %v691_v14, %v2620_v63  ;;  %v2744_v49 = vpop.permute.xlu1 %2743  ;;  %v1142_v63 = vsel %vm446_vm3, %v4066_v29, %v2736_v33  ;;  %v698_v14 = vsel %vm446_vm3, %v4055_v32, %v2735_v36 }
 0x243   : > { %v4459_v31 = vpop.permute.xlu0 %2798  ;;  %v693_v9 = vsel %vm450_vm5, %v692_v1, %v2760_v48  ;;  %v1137_v7 = vsel %vm450_vm5, %v1136_v12, %v2761_v22  ;;  %v2746_v48 = vunpack.i.h.bf16 %v2744_v49  ;;  %v2745_v10 = vunpack.i.l.bf16 %v2744_v49 }
 0x244   : > { %v4466_v53 = vsel %vm452_vm6, %v693_v9, %v2640_v21  ;;  %v4469_v41 = vsel %vm452_vm6, %v1137_v7, %v2641_v8  ;;  %v2676_v22 = vunpack.i.h.bf16 %v4391_v34  ;;  %v2675_v1 = vunpack.i.l.bf16 %v4391_v34 }
 0x245   : > { %v2646_v21 = vunpack.i.h.bf16 %v4349_v27  ;;  %v2645_v8 = vunpack.i.l.bf16 %v4349_v27  ;;  %v2756_v32 = vunpack.i.h.bf16 %v4430_v35  ;;  %v2755_v49 = vunpack.i.l.bf16 %v4430_v35 }
 0x246   : > { %v2749_v9 = vpop.permute.xlu1 %2748  ;;  %v699_v36 = vsel %vm448_vm4, %v698_v14, %v2615_v19  ;;  %v1143_v34 = vsel %vm448_vm4, %v1142_v63, %v2616_v4  ;;  %v928_v12 = vsel %vm446_vm3, %v4162_v46, %v2746_v48  ;;  %v460_v27 = vsel %vm446_vm3, %v4174_v5, %v2745_v10 }
 0x247   : > { %v2751_v18 = vunpack.i.h.bf16 %v2749_v9  ;;  %v2750_v29 = vunpack.i.l.bf16 %v2749_v9  ;;  %v4481_v33 = vpop.permute.xlu0 %2813  ;;  %v2650_v4 = vunpack.i.l.bf16 %v4363_v42  ;;  %v2656_v46 = vunpack.i.h.bf16 %v4382_v45 }
 0x248   : > { %v447_v48 = vsel %vm446_vm3, %v4097_v40, %v2755_v49  ;;  %v5014_v10 = vunpack.i.h.bf16 %v4327_v11  ;;  %v2671_v40 = vunpack.i.h.bf16 %v4389_v30 }
 0x249   : > { %v700_v7 = vsel %vm450_vm5, %v699_v36, %v2750_v29  ;;  %v1144_v9 = vsel %vm450_vm5, %v1143_v34, %v2751_v18  ;;  %v921_v18 = vsel %vm446_vm3, %v4082_v2, %v2756_v32  ;;  %v2655_v2 = vunpack.i.l.bf16 %v4382_v45 }
 0x24a   : > { %v2764_v37 = vpop.permute.xlu1 %2763  ;;  %v701_v35 = vsel %vm452_vm6, %v700_v7, %v2630_v51  ;;  %v1145_v19 = vsel %vm452_vm6, %v1144_v9, %v2631_v28  ;;  %v5013_v51 = vunpack.i.l.bf16 %v4327_v11  ;;  %v929_v42 = vsel %vm448_vm4, %v928_v12, %v5014_v10 }
 0x24b   : > { %v2766_v63 = vunpack.i.h.bf16 %v2764_v37  ;;  %v2765_v5 = vunpack.i.l.bf16 %v2764_v37  ;;  %v4499_v14 = vpop.permute.xlu0 %2818  ;;  %v2796_v7 = vunpack.i.h.bf16 %v4445_v62  ;;  %v2795_v37 = vunpack.i.l.bf16 %v4445_v62 }
 0x24c   : > { %v461_v28 = vsel %vm448_vm4, %v460_v27, %v5013_v51  ;;  %v449_v51 = vsel %vm448_vm4, %v447_v48, %v2635_v52 }
 0x24d   : > { %v462_v29 = vsel %vm450_vm5, %v461_v28, %v2765_v5  ;;  %v930_v36 = vsel %vm450_vm5, %v929_v42, %v2766_v63  ;;  %v2801_v5 = vunpack.i.h.bf16 %v4459_v31  ;;  %v2800_v63 = vunpack.i.l.bf16 %v4459_v31 }
 0x24e   : > { %v463_v32 = vsel %vm452_vm6, %v462_v29, %v2645_v8  ;;  %v931_v49 = vsel %vm452_vm6, %v930_v36, %v2646_v21  ;;  %v2769_v34 = vpop.permute.xlu1 %2768  ;;  %v5015_v28 = vunpack.i.h.bf16 %v4310_v54 }
 0x24f   : > { %v2771_v11 = vunpack.i.h.bf16 %v2769_v34  ;;  %v2770_v27 = vunpack.i.l.bf16 %v2769_v34  ;;  %v2834_v12 = vpop.permute.xlu0 %2833  ;;  %v464_v9 = vsel %vm454_vm7, %v463_v32, %v2795_v37  ;;  %v932_v62 = vsel %vm454_vm7, %v931_v49, %v2796_v7 }
 0x250   : > { %v922_v8 = vsel %vm448_vm4, %v921_v18, %v5015_v28  ;;  %v2836_v42 = vunpack.i.h.bf16 %v2834_v12  ;;  %v2835_v29 = vunpack.i.l.bf16 %v2834_v12  ;;  %v465_v37 = vsel %vm456_vm8, %v464_v9, %v2675_v1 }
 0x251   : > { %v702_v21 = vsel %vm454_vm7, %v701_v35, %v2770_v27  ;;  %v1146_v10 = vsel %vm454_vm7, %v1145_v19, %v2771_v11  ;;  %v933_v32 = vsel %vm456_vm8, %v932_v62, %v2676_v22  ;;  %v2816_v19 = vunpack.i.h.bf16 %v4481_v33 }
 0x252   : > { %v2779_v36 = vpop.permute.xlu1 %2778  ;;  %v703_v7 = vsel %vm456_vm8, %v702_v21, %v2650_v4  ;;  %v1147_v31 = vsel %vm456_vm8, %v1146_v10, %v2651_v26  ;;  %v2815_v49 = vunpack.i.l.bf16 %v4481_v33  ;;  %v466_v26 = vsel %vm458_vm9, %v465_v37, %v2835_v29 }
 0x253   : > { %v2781_v52 = vunpack.i.h.bf16 %v2779_v36  ;;  %v2780_v48 = vunpack.i.l.bf16 %v2779_v36  ;;  %v4533_v54 = vpop.permute.xlu0 %2838  ;;  %v704_v18 = vsel %vm458_vm9, %v703_v7, %v2800_v63  ;;  %v1148_v35 = vsel %vm458_vm9, %v1147_v31, %v2801_v5 }
 0x254   : > { %v2302_v34 = vrot.slane %v704_v18, 4  ;;  %v2308_v1 = vrot.slane %v1148_v35, 4  ;;  %v934_v11 = vsel %vm458_vm9, %v933_v32, %v2836_v42  ;;  %v5016_v27 = vunpack.i.l.bf16 %v4361_v47 }
 0x255   : > { %v451_v4 = vsel %vm450_vm5, %v449_v51, %v2780_v48  ;;  %v923_v22 = vsel %vm450_vm5, %v922_v8, %v2781_v52  ;;  %v5017_v9 = vunpack.i.h.bf16 %v4361_v47  ;;  %v2670_v42 = vunpack.i.l.bf16 %v4389_v30 }
 0x256   : > { %v453_v12 = vsel %vm452_vm6, %v451_v4, %v5016_v27  ;;  %v2784_v5 = vpop.permute.xlu1 %2783  ;;  %v2325_v33 = vsel %vm2323_vm10, %v466_v26, %v2302_v34  ;;  %v2327_v63 = vsel %vm2323_vm10, %v934_v11, %v2308_v1  ;;  %v2776_v29 = vunpack.i.h.bf16 %v4436_v59 }
 0x257   : > { %v924_v62 = vsel %vm452_vm6, %v923_v22, %v5017_v9  ;;  %v2786_v51 = vunpack.i.h.bf16 %v2784_v5  ;;  %v2785_v28 = vunpack.i.l.bf16 %v2784_v5  ;;  %v4551_v8 = vpop.permute.xlu0 %2843  ;;  %v2532_v21 = vpack.c.bf16 %v2327_v63, %v2325_v33 }
 0x258   : > { %v455_v10 = vsel %vm454_vm7, %v453_v12, %v2815_v49  ;;  %v925_v36 = vsel %vm454_vm7, %v924_v62, %v2816_v19  ;;  %v2775_v37 = vunpack.i.l.bf16 %v4436_v59  ;;  %v5018_v31 = vunpack.i.h.bf16 %v4401_v44 }
 0x259   : > { %v4559_v47 = vsel %vm456_vm8, %v455_v10, %v2690_v60  ;;  %v695_v7 = vsel %vm454_vm7, %v4466_v53, %v2785_v28  ;;  %v1139_v32 = vsel %vm454_vm7, %v4469_v41, %v2786_v51  ;;  %2533 = vmatprep.subr.bf16.mxu0 %v2532_v21  ;;  %v2681_v48 = vunpack.i.h.bf16 %v4396_v23 }
 0x25a   : > { %v4570_v52 = vsel %vm456_vm8, %v925_v36, %v5018_v31  ;;  %v2680_v60 = vunpack.i.l.bf16 %v4396_v23  ;;  %v5019_v18 = vunpack.i.l.bf16 %v4380_v38  ;;  %v5020_v35 = vunpack.i.h.bf16 %v4380_v38  ;;  %v2789_v19 = vpop.permute.xlu1 %2788 }
 0x25b   : > { %v2686_v41 = vunpack.i.h.bf16 %v4403_v50  ;;  %v2685_v44 = vunpack.i.l.bf16 %v4403_v50  ;;  %v2696_v49 = vunpack.i.h.bf16 %v4406_v58  ;;  %v2695_v34 = vunpack.i.l.bf16 %v4406_v58  ;;  %v4584_v1 = vpop.permute.xlu0 %2853 }
 0x25c   : > { %v696_v59 = vsel %vm456_vm8, %v695_v7, %v5019_v18  ;;  %v1140_v53 = vsel %vm456_vm8, %v1139_v32, %v5020_v35  ;;  %v2716_v23 = vunpack.i.h.bf16 %v4408_v39  ;;  %v2715_v4 = vunpack.i.l.bf16 %v4408_v39 }
 0x25d   : > { %v2701_v22 = vunpack.i.h.bf16 %v4410_v25  ;;  %v2700_v38 = vunpack.i.l.bf16 %v4410_v25  ;;  %v2721_v26 = vunpack.i.h.bf16 %v4412_v20  ;;  %v2720_v11 = vunpack.i.l.bf16 %v4412_v20 }
 0x25e   : > { %v2062_v50 = vsel %vm446_vm3, %v4119_v61, %v2776_v29  ;;  %v1610_v27 = vsel %vm446_vm3, %v4129_v0, %v2775_v37  ;;  %v2706_v12 = vunpack.i.h.bf16 %v4414_v3  ;;  %v2705_v9 = vunpack.i.l.bf16 %v4414_v3  ;;  %v2804_v33 = vpop.permute.xlu1 %2803 }
 0x25f   : > { %v2711_v62 = vunpack.i.h.bf16 %v4418_v6  ;;  %v2710_v5 = vunpack.i.l.bf16 %v4418_v6  ;;  %v2731_v63 = vunpack.i.h.bf16 %v4426_v57  ;;  %v2730_v51 = vunpack.i.l.bf16 %v4426_v57  ;;  %v4602_v10 = vpop.permute.xlu0 %2858 }
 0x260   : > { %v2806_v28 = vunpack.i.h.bf16 %v2804_v33  ;;  %v2805_v21 = vunpack.i.l.bf16 %v2804_v33  ;;  %v2821_v61 = vunpack.i.h.bf16 %v4499_v14  ;;  %v2820_v0 = vunpack.i.l.bf16 %v4499_v14 }
 0x261   : > { %v1611_v3 = vsel %vm448_vm4, %v1610_v27, %v2655_v2  ;;  %v2063_v6 = vsel %vm448_vm4, %v2062_v50, %v2656_v46  ;;  %v2841_v29 = vunpack.i.h.bf16 %v4533_v54  ;;  %v2840_v36 = vunpack.i.l.bf16 %v4533_v54 }
 0x262   : > { %v1824_v37 = vsel %vm446_vm3, %v4261_v16, %v2806_v28  ;;  %v1380_v7 = vsel %vm446_vm3, %v4250_v43, %v2805_v21  ;;  %v2791_v32 = vunpack.i.h.bf16 %v2789_v19  ;;  %v2790_v14 = vunpack.i.l.bf16 %v2789_v19  ;;  %v2809_v18 = vpop.permute.xlu1 %2808 }
 0x263   : > { %v1825_v31 = vsel %vm448_vm4, %v1824_v37, %v2681_v48  ;;  %v1381_v2 = vsel %vm448_vm4, %v1380_v7, %v2680_v60  ;;  %v2811_v45 = vunpack.i.h.bf16 %v2809_v18  ;;  %v2810_v35 = vunpack.i.l.bf16 %v2809_v18  ;;  %v2874_v46 = vpop.permute.xlu0 %2873 }
 0x264   : > { %v1382_v50 = vsel %vm450_vm5, %v1381_v2, %v2840_v36  ;;  %v1826_v54 = vsel %vm450_vm5, %v1825_v31, %v2841_v29  ;;  %v2846_v27 = vunpack.i.h.bf16 %v4551_v8  ;;  %v2845_v16 = vunpack.i.l.bf16 %v4551_v8 }
 0x265   : > { %v4625_v43 = vsel %vm452_vm6, %v1382_v50, %v2705_v9  ;;  %v4628_v19 = vsel %vm452_vm6, %v1826_v54, %v2706_v12  ;;  %v1612_v48 = vsel %vm450_vm5, %v1611_v3, %v2810_v35  ;;  %v2064_v60 = vsel %vm450_vm5, %v2063_v6, %v2811_v45 }
 0x266   : > { %v697_v33 = vsel %vm458_vm9, %v696_v59, %v2820_v0  ;;  %v1141_v28 = vsel %vm458_vm9, %v1140_v53, %v2821_v61  ;;  %v2055_v21 = vsel %vm446_vm3, %v4231_v55, %v2791_v32  ;;  %v1603_v8 = vsel %vm446_vm3, %v4239_v13, %v2790_v14  ;;  %v2824_v12 = vpop.permute.xlu1 %2823 }
 0x267   : > { %v1613_v9 = vsel %vm452_vm6, %v1612_v48, %v2685_v44  ;;  %v2065_v29 = vsel %vm452_vm6, %v2064_v60, %v2686_v41  ;;  %v2826_v36 = vunpack.i.h.bf16 %v2824_v12  ;;  %v2825_v37 = vunpack.i.l.bf16 %v2824_v12  ;;  %v4640_v3 = vpop.permute.xlu0 %2878 }
 0x268   : > { %v1614_v6 = vsel %vm454_vm7, %v1613_v9, %v2845_v16  ;;  %v2066_v59 = vsel %vm454_vm7, %v2065_v29, %v2846_v27  ;;  %v2856_v53 = vunpack.i.h.bf16 %v4584_v1  ;;  %v2855_v55 = vunpack.i.l.bf16 %v4584_v1 }
 0x269   : > { %v4647_v61 = vsel %vm456_vm8, %v1614_v6, %v2710_v5  ;;  %v4650_v13 = vsel %vm456_vm8, %v2066_v59, %v2711_v62  ;;  %v1817_v41 = vsel %vm446_vm3, %v4291_v15, %v2826_v36  ;;  %v1373_v44 = vsel %vm446_vm3, %v4280_v24, %v2825_v37 }
 0x26a   : > { %v1604_v0 = vsel %vm448_vm4, %v1603_v8, %v2670_v42  ;;  %v2056_v1 = vsel %vm448_vm4, %v2055_v21, %v2671_v40  ;;  %v2876_v7 = vunpack.i.h.bf16 %v2874_v46  ;;  %v2875_v5 = vunpack.i.l.bf16 %v2874_v46  ;;  %v2829_v32 = vpop.permute.xlu1 %2828 }
 0x26b   : > { %v1818_v62 = vsel %vm448_vm4, %v1817_v41, %v2696_v49  ;;  %v1374_v15 = vsel %vm448_vm4, %v1373_v44, %v2695_v34  ;;  %v2831_v42 = vunpack.i.h.bf16 %v2829_v32  ;;  %v2830_v31 = vunpack.i.l.bf16 %v2829_v32  ;;  %v4670_v30 = vpop.permute.xlu0 %2883 }
 0x26c   : > { %v1375_v24 = vsel %vm450_vm5, %v1374_v15, %v2855_v55  ;;  %v1819_v14 = vsel %vm450_vm5, %v1818_v62, %v2856_v53  ;;  %v2861_v40 = vunpack.i.h.bf16 %v4602_v10  ;;  %v2860_v2 = vunpack.i.l.bf16 %v4602_v10 }
 0x26d   : > { %v1376_v49 = vsel %vm452_vm6, %v1375_v24, %v2715_v4  ;;  %v1820_v58 = vsel %vm452_vm6, %v1819_v14, %v2716_v23  ;;  %v1605_v34 = vsel %vm450_vm5, %v1604_v0, %v2830_v31  ;;  %v2057_v18 = vsel %vm450_vm5, %v2056_v1, %v2831_v42 }
 0x26e   : > { %v1377_v45 = vsel %vm454_vm7, %v1376_v49, %v2875_v5  ;;  %v1821_v35 = vsel %vm454_vm7, %v1820_v58, %v2876_v7  ;;  %v1606_v10 = vsel %vm452_vm6, %v1605_v34, %v2700_v38  ;;  %v2058_v4 = vsel %vm452_vm6, %v2057_v18, %v2701_v22  ;;  %v2849_v46 = vpop.permute.xlu1 %2848 }
 0x26f   : > { %v1378_v39 = vsel %vm456_vm8, %v1377_v45, %v2730_v51  ;;  %v1822_v23 = vsel %vm456_vm8, %v1821_v35, %v2731_v63  ;;  %v1607_v50 = vsel %vm454_vm7, %v1606_v10, %v2860_v2  ;;  %v2059_v54 = vsel %vm454_vm7, %v2058_v4, %v2861_v40  ;;  %v2259_v38 = vpop.permute.xlu0 %2258 }
 0x270   : > { %v2851_v27 = vunpack.i.h.bf16 %v2849_v46  ;;  %v2850_v16 = vunpack.i.l.bf16 %v2849_v46  ;;  %v2301_v48 = vrot.slane %v697_v33, 4  ;;  %v2307_v25 = vrot.slane %v1141_v28, 4  ;;  %v5023_v46 = vld [vmem:[#allocation20_spill] sm:$0xff] }
 0x271   : > { %v1608_v22 = vsel %vm456_vm8, %v1607_v50, %v2720_v11  ;;  %v2060_v51 = vsel %vm456_vm8, %v2059_v54, %v2721_v26  ;;  %v2726_v11 = vunpack.i.h.bf16 %v4422_v17  ;;  %v2725_v20 = vunpack.i.l.bf16 %v4422_v17 }
 0x272   : > { %v459_v57 = vsel %vm458_vm9, %v4559_v47, %v2850_v16  ;;  %v927_v63 = vsel %vm458_vm9, %v4570_v52, %v2851_v27  ;;  %v2864_v60 = vpop.permute.xlu1 %2863  ;;  %v2880_v26 = vunpack.i.l.bf16 %v4640_v3  ;;  %v2292_v47 = vsel %vm446_vm3, %v4323_v56, %v2259_v38  ;;  %v5024_v27 = vld [vmem:[#allocation13_spill] sm:$0xff] }
 0x273   : > { %v2324_v21 = vsel %vm2323_vm10, %v459_v57, %v2301_v48  ;;  %v2326_v33 = vsel %vm2323_vm10, %v927_v63, %v2307_v25  ;;  %v2866_v28 = vunpack.i.h.bf16 %v2864_v60  ;;  %v2865_v8 = vunpack.i.l.bf16 %v2864_v60  ;;  %v2267_v9 = vpop.permute.xlu0 %2266  ;;  %v5027_v60 = vld [vmem:[#allocation26_spill] sm:$0xff] }
 0x274   : > { %v2534_v29 = vpack.c.bf16 %v2326_v33, %v2324_v21  ;;  %v2881_v59 = vunpack.i.h.bf16 %v4640_v3  ;;  %v1609_v55 = vsel %vm458_vm9, %v1608_v22, %v2880_v26  ;;  %v2886_v56 = vunpack.i.h.bf16 %v4670_v30  ;;  %v5026_v22 = vld [vmem:[#allocation19_spill] sm:$0xff] }
 0x275   : > { %v1384_v52 = vsel %vm454_vm7, %v4625_v43, %v2865_v8  ;;  %v1828_v12 = vsel %vm454_vm7, %v4628_v19, %v2866_v28  ;;  %v2885_v41 = vunpack.i.l.bf16 %v4670_v30  ;;  %v5021_v43 = vld [vmem:[#allocation21_spill] sm:$0xff]  ;;  %v2313_v32 = vrot.slane %v1609_v55, 4  ;;  %v5022_v30 = vld [vmem:[#allocation12_spill] sm:$0xff]  ;;  %v2332_v28 = vld [vmem:[#allocation6] sm:$0xff] }
 0x276   : > { %2535 = vmatpush1.bf16.msra.mxu0 %v2534_v29  ;;  %v1385_v36 = vsel %vm456_vm8, %v1384_v52, %v2725_v20  ;;  %v1829_v37 = vsel %vm456_vm8, %v1828_v12, %v2726_v11  ;;  %v2869_v6 = vpop.permute.xlu1 %2868  ;;  %v2293_v44 = vsel %vm448_vm4, %v2292_v47, %v5021_v43  ;;  %v2061_v7 = vsel %vm458_vm9, %v2060_v51, %v2881_v59 }
 0x277   : > { %v2871_v17 = vunpack.i.h.bf16 %v2869_v6  ;;  %v2870_v53 = vunpack.i.l.bf16 %v2869_v6  ;;  %v2275_v19 = vpop.permute.xlu0 %2274  ;;  %v2294_v0 = vsel %vm450_vm5, %v2293_v44, %v2267_v9  ;;  %v1386_v42 = vsel %vm458_vm9, %v1385_v36, %v2885_v41 }
 0x278   : > { %v1830_v31 = vsel %vm458_vm9, %v1829_v37, %v2886_v56  ;;  %v2295_v40 = vsel %vm452_vm6, %v2294_v0, %v5022_v30 }
 0x279   : > { %v1616_v1 = vsel %vm458_vm9, %v4647_v61, %v2870_v53  ;;  %v2068_v3 = vsel %vm458_vm9, %v4650_v13, %v2871_v17  ;;  %v2319_v13 = vrot.slane %v2061_v7, 4  ;;  %v2296_v49 = vsel %vm454_vm7, %v2295_v40, %v2275_v19 }
 0x27a   : > { %v2314_v5 = vrot.slane %v1616_v1, 4  ;;  %v2320_v62 = vrot.slane %v2068_v3, 4  ;;  %v2889_v15 = vpop.permute.xlu1 %2888  ;;  %v2297_v16 = vsel %vm456_vm8, %v2296_v49, %v5024_v27 }
 0x27b   : > { %v2891_v24 = vunpack.i.h.bf16 %v2889_v15  ;;  %v2890_v14 = vunpack.i.l.bf16 %v2889_v15  ;;  %v2283_v45 = vpop.permute.xlu0 %2282 }
 0x27c   : > { %v2329_v61 = vsel %vm2323_vm10, %v1386_v42, %v2314_v5  ;;  %v2331_v2 = vsel %vm2323_vm10, %v1830_v31, %v2320_v62  ;;  %v2298_v38 = vsel %vm458_vm9, %v2297_v16, %v2283_v45 }
 0x27d   : > { %v1379_v58 = vsel %vm458_vm9, %v1378_v39, %v2890_v14  ;;  %v1823_v34 = vsel %vm458_vm9, %v1822_v23, %v2891_v24  ;;  %v2536_v18 = vpack.c.bf16 %v2331_v2, %v2329_v61  ;;  %v5025_v39 = vld [vmem:[#allocation18_spill] sm:$0xff] }
 0x27e   : > { %v2231_v35 = vpop.permute.xlu1 %2230  ;;  %v2328_v10 = vsel %vm2323_vm10, %v1379_v58, %v2313_v32  ;;  %v2330_v4 = vsel %vm2323_vm10, %v1823_v34, %v2319_v13 }
 0x27f   : > { %v2285_v50 = vsel %vm446_vm3, %v5023_v46, %v2231_v35  ;;  %2537 = vmatprep.subr.bf16.mxu0 %v2536_v18  ;;  %v2538_v54 = vpack.c.bf16 %v2330_v4, %v2328_v10 }
 0x280   : > { %v2286_v23 = vsel %vm448_vm4, %v2285_v50, %v5025_v39 }
 0x281   : > { %2539 = vmatpush1.bf16.msra.mxu0 %v2538_v54 }
 0x282   : > { %v2239_v48 = vpop.permute.xlu1 %2238  ;;  %2522 = vmatprep.subr.msk.mxu0 %vm2323_vm10, %v2298_v38 }
 0x283   : > { %v2287_v25 = vsel %vm450_vm5, %v2286_v23, %v2239_v48 }
 0x284   : > { %v2288_v51 = vsel %vm452_vm6, %v2287_v25, %v5026_v22 }
 0x286   : > { %v2247_v57 = vpop.permute.xlu1 %2246 }
 0x287   : > { %v2289_v63 = vsel %vm454_vm7, %v2288_v51, %v2247_v57 }
 0x288   : > { %v2290_v21 = vsel %vm456_vm8, %v2289_v63, %v5027_v60 }
 0x28a   : > { %v2255_v33 = vpop.permute.xlu1 %2254 }
 0x28b   : > { %v2291_v8 = vsel %vm458_vm9, %v2290_v21, %v2255_v33 }
 0x28c   : > { %2523 = vmatpush1.msk.msra.mxu0 %vm2323_vm10, %v2291_v8 }
 0x28d   : > { %2524 = vmatmul.mubr.msk.f32.vlgmr.msra.gmra.mrb[0].mxu0 %vm2333_vm11, %v2332_v28 }
 0x360   : > { %v2409_v9 = vpop.f32.mrb[0].mxu0 }
 0x361   : > { %2414 = vst [vmem:[%s174_s17] sm:$0xff] %v2409_v9  ;;  %v2411_v29 = vpop.f32.mrb[1].mxu0 }
 0x362   : > { %2415 = vst [vmem:[%s174_s17 + $0x8] sm:$0xff] %v2411_v29 }
 0x363   : > { %2987 = shalt.err (!%p2984_p13)
}
 0x364   : > { %s2988_s4 = scalar_lea.hbm %s4767_s25, 256  ;;  %s2992_s26 = scalar_lea.hbm %s4811_s2, 512 }
 0x365   : > { %p2989_p7 = scmp.ne.s32.totalorder %s4767_s25, %s2988_s4  ;;  %p2993_p1 = scmp.lt.u32.totalorder %s4767_s25, %s4811_s2 }
 0x366   : > { %p2994_p11 = scmp.lt.u32.totalorder %s2992_s26, %s2988_s4  ;;  %p2996_p9 = scmp.lt.u32.totalorder %s2988_s4, %s4767_s25 }
 0x367   : > { %p2990_p3 = pnand %p2989_p7, %p5028_p10 }
 0x368   : > { %p2995_p8 = por %p2994_p11, %p2993_p1 }
 0x369   : > { %p2991_p12 = pneg %p2990_p3 }
 0x36a   : > { %p2997_p2 = por %p2996_p9, %p2995_p8 }
 0x36c   : > { %p2998_p4 = pnand %p2997_p2, %p2991_p12 }
 0x36e   : > { %3001 = shalt.err (!%p2998_p4)
}
 0x36f   : > { %2546 = dma.vmem_to_hbm [thread:$0]  (%p5028_p10), %s4762_s19, 256, %s4767_s25, %s2417_s29  }
 0x370 PF: > { %s2443_s14 = sand.u32 1, %s3032_s9   ;;  %p5029_p5 = scmp.ne.s32.totalorder %s4870_s22, 0 }
 0x371   : > { %p5030_p0 = scmp.ge.s32.totalorder %s3044_s12, 2  ;;  %s2444_s27 = scalar_lea.sflag [#allocation5], %s2443_s14 }
 0x373   : > { %p2557_p6 = pnand %p5030_p0, %p5029_p5 }
 0x375   : > { %3027 = dma.done.wait (!%p2557_p6), %s2444_s27, 256  }
 0x376   : > { %3029 = vsyncadd (!%p2557_p6), %s2444_s27, 4294967040  ;;  %p16_p13 = scmp.ge.s32.totalorder %s3104_s15, 4   ;;  %s5031_s9 = smov %s3036_s10 }
 0x377   : > { %s5032_s10 = smov %s3040_s11  ;;  %s5033_s11 = smov %s3116_s18 }
 0x378   : > { %s5034_s12 = smov %s3104_s15  ;;  %18 = sbr.rel (!%p16_p13) target bundleno = 6 (0x6), region = 77 }
 0x37f   :  { %2449 = vsyncpa [#allocation4], 1 }
 0x380   :  { %2451 = vsyncpa [#allocation4 + $0x1], 1 }
 0x381   :  { %2452 = vsyncpa [#allocation7], 1 }
 0x382   :  { %2453 = vsyncpa [#allocation5], 1 }
 0x383   :  { %2455 = vsyncpa [#allocation5 + $0x1], 1 }

</bundles_post_ra>
